<compile_context>
chip_gen: v7x
topology: tpu7x:2x2x1
jax: 0.10.0
libtpu: 0.0.40
codegen_flags: <defaults>
</compile_context>

<pallas_src>
import functools

import jax
import jax.numpy as jnp
from jax.experimental import pallas as pl
from jax.experimental.pallas import tpu as pltpu

LEAKY_SLOPE = 0.01          # nn.LeakyReLU() default
BN_EPS = 1e-5               # nn.BatchNorm2d default
VMEM_LIMIT = 32 * 1024 * 1024
MAX_TILE_M = 512            # ~85% of HBM roofline per-tile sweet spot


def _round_up(x, m):
    return ((x + m - 1) // m) * m


def _row_tiles(m):
    """Pick an M tile (multiple of 8, <= MAX_TILE_M) and the grid size."""
    tm = min(MAX_TILE_M, _round_up(m, 8))
    return tm, pl.cdiv(m, tm)


def _mosaic(semantics):
    return pltpu.CompilerParams(dimension_semantics=semantics,
                                vmem_limit_bytes=VMEM_LIMIT)


def _stats_rows(s, q):
    """Pack [1,C] sum and [1,C] sumsq into an [8,C] slab (rows 0/1, rest 0)."""
    c = s.shape[-1]
    ridx = jax.lax.broadcasted_iota(jnp.int32, (8, c), 0)
    return jnp.where(ridx == 0, jnp.broadcast_to(s, (8, c)),
                     jnp.where(ridx == 1, jnp.broadcast_to(q, (8, c)),
                               jnp.zeros((8, c), jnp.float32)))


# --------------------------------------------------------------------------
# Pallas kernels
# --------------------------------------------------------------------------
def _gemm_kernel(x_ref, w_ref, b_ref, y_ref, st_ref, *, tm, m_valid, apply_lrelu):
    """y = lrelu(x @ w + b) (bf16 in, f32 acc) + per-tile channel sum/sumsq.

    x_ref: [1, tm, K] bf16   w_ref: [1, K, C] bf16   b_ref: [1, C] f32
    y_ref: [1, tm, C]        st_ref: [1, 1, 8, C] f32 (row0=sum, row1=sumsq)
    """
    x = x_ref[0]
    w = w_ref[0]
    acc = jnp.dot(x, w, preferred_element_type=jnp.float32) + b_ref[...]
    if apply_lrelu:
        acc = jnp.where(acc >= 0.0, acc, LEAKY_SLOPE * acc)
    y_ref[...] = acc.astype(y_ref.dtype)[None]

    # Per-channel partial statistics; mask rows past m_valid (ragged last tile).
    row = pl.program_id(1) * tm + jax.lax.broadcasted_iota(jnp.int32, (tm, 1), 0)
    accm = jnp.where(row < m_valid, acc, 0.0)
    s = jnp.sum(accm, axis=0, keepdims=True)
    q = jnp.sum(accm * accm, axis=0, keepdims=True)
    st_ref[...] = _stats_rows(s, q)[None, None]


def _bn_apply_kernel(y_ref, sc_ref, sh_ref, o_ref):
    """o = y*scale + shift (per channel)."""
    z = y_ref[...].astype(jnp.float32) * sc_ref[...] + sh_ref[...]
    o_ref[...] = z.astype(o_ref.dtype)


def _bn_concat_kernel(a_ref, b_ref, sc_ref, sh_ref, o_ref):
    """o = BN(concat([a, b], -1)) with precomputed per-channel scale/shift."""
    x = jnp.concatenate([a_ref[...].astype(jnp.float32),
                         b_ref[...].astype(jnp.float32)], axis=-1)
    o_ref[...] = (x * sc_ref[...] + sh_ref[...]).astype(o_ref.dtype)


def _concat_matmul_kernel(a_ref, b_ref, wa_ref, wb_ref, bias_ref, o_ref):
    """Final fused stage with BN folded into the 1x1 conv weights:
    o = a @ wa + b @ wb + bias   (== BN(concat([a,b])) @ W_final + b_final)."""
    o_ref[...] = (jnp.dot(a_ref[...].astype(jnp.float32), wa_ref[...],
                          preferred_element_type=jnp.float32)
                  + jnp.dot(b_ref[...].astype(jnp.float32), wb_ref[...],
                            preferred_element_type=jnp.float32)
                  + bias_ref[...])


# --------------------------------------------------------------------------
# pallas_call wrappers
# --------------------------------------------------------------------------
def gemm_lrelu_stats(cols, wmats, bias, *, apply_lrelu):
    """cols: [G, M, K], wmats: [G, K, C], bias: [C]  ->  (y [G,M,C] bf16,
    stats [G, gm, 8, C] f32). G = weight groups (1 for conv, 4 convT phases)."""
    G, M, K = cols.shape
    C = wmats.shape[-1]
    tm, gm = _row_tiles(M)
    kern = functools.partial(_gemm_kernel, tm=tm, m_valid=M,
                             apply_lrelu=apply_lrelu)
    return pl.pallas_call(
        kern,
        out_shape=(jax.ShapeDtypeStruct((G, M, C), jnp.bfloat16),
                   jax.ShapeDtypeStruct((G, gm, 8, C), jnp.float32)),
        grid=(G, gm),
        in_specs=[
            pl.BlockSpec((1, tm, K), lambda g, i: (g, i, 0)),
            pl.BlockSpec((1, K, C), lambda g, i: (g, 0, 0)),
            pl.BlockSpec((1, C), lambda g, i: (0, 0)),
        ],
        out_specs=[
            pl.BlockSpec((1, tm, C), lambda g, i: (g, i, 0)),
            pl.BlockSpec((1, 1, 8, C), lambda g, i: (g, i, 0, 0)),
        ],
        compiler_params=_mosaic(("parallel", "parallel")),
    )(cols.astype(jnp.bfloat16), wmats.astype(jnp.bfloat16),
      bias.reshape(1, C).astype(jnp.float32))


def bn_apply(y2d, scale, shift):
    """y2d: [M, C] bf16 -> normalized [M,C] bf16."""
    M, C = y2d.shape
    tm, gm = _row_tiles(M)
    return pl.pallas_call(
        _bn_apply_kernel,
        out_shape=jax.ShapeDtypeStruct((M, C), jnp.bfloat16),
        grid=(gm,),
        in_specs=[
            pl.BlockSpec((tm, C), lambda i: (i, 0)),
            pl.BlockSpec((1, C), lambda i: (0, 0)),
            pl.BlockSpec((1, C), lambda i: (0, 0)),
        ],
        out_specs=pl.BlockSpec((tm, C), lambda i: (i, 0)),
        compiler_params=_mosaic(("parallel",)),
    )(y2d, scale.reshape(1, C).astype(jnp.float32),
      shift.reshape(1, C).astype(jnp.float32))


def bn_concat(a2d, b2d, scale, shift):
    M, Ca = a2d.shape
    Cb = b2d.shape[1]
    C = Ca + Cb
    tm, gm = _row_tiles(M)
    return pl.pallas_call(
        _bn_concat_kernel,
        out_shape=jax.ShapeDtypeStruct((M, C), jnp.bfloat16),
        grid=(gm,),
        in_specs=[
            pl.BlockSpec((tm, Ca), lambda i: (i, 0)),
            pl.BlockSpec((tm, Cb), lambda i: (i, 0)),
            pl.BlockSpec((1, C), lambda i: (0, 0)),
            pl.BlockSpec((1, C), lambda i: (0, 0)),
        ],
        out_specs=pl.BlockSpec((tm, C), lambda i: (i, 0)),
        compiler_params=_mosaic(("parallel",)),
    )(a2d, b2d, scale.reshape(1, C).astype(jnp.float32),
      shift.reshape(1, C).astype(jnp.float32))


def concat_matmul_bnfold(a2d, b2d, scale, shift, w_final, b_final):
    """BN(concat([a,b])) @ w_final + b_final, with BN folded into the weights:
       (x*s + t) @ W + b  ==  x @ (s[:,None]*W) + (t @ W + b)."""
    M, Ca = a2d.shape
    Cb = b2d.shape[1]
    Co = w_final.shape[1]
    w_fold = scale[:, None] * w_final           # [Ca+Cb, Co]
    b_fold = shift @ w_final + b_final          # [Co]
    wa = w_fold[:Ca]
    wb = w_fold[Ca:]
    tm, gm = _row_tiles(M)
    return pl.pallas_call(
        _concat_matmul_kernel,
        out_shape=jax.ShapeDtypeStruct((M, Co), jnp.float32),
        grid=(gm,),
        in_specs=[
            pl.BlockSpec((tm, Ca), lambda i: (i, 0)),
            pl.BlockSpec((tm, Cb), lambda i: (i, 0)),
            pl.BlockSpec((Ca, Co), lambda i: (0, 0)),
            pl.BlockSpec((Cb, Co), lambda i: (0, 0)),
            pl.BlockSpec((1, Co), lambda i: (0, 0)),
        ],
        out_specs=pl.BlockSpec((tm, Co), lambda i: (i, 0)),
        compiler_params=_mosaic(("parallel",)),
    )(a2d, b2d, wa.astype(jnp.float32), wb.astype(jnp.float32),
      b_fold.reshape(1, Co).astype(jnp.float32))


# --------------------------------------------------------------------------
# Plain-JAX glue: im2col / ConvTranspose phase decomposition / stats finalize
# --------------------------------------------------------------------------
def _finalize_stats(st, count):
    """st: [..., 8, C] per-tile partial sums -> (mean, biased var) per channel."""
    C = st.shape[-1]
    flat = st.reshape(-1, 8, C)
    s = jnp.sum(flat[:, 0, :], axis=0)
    q = jnp.sum(flat[:, 1, :], axis=0)
    mean = s / count
    var = jnp.maximum(q / count - mean * mean, 0.0)
    return mean, var


def _bn_scale_shift(gamma, beta, mean, var):
    scale = gamma * jax.lax.rsqrt(var + BN_EPS)
    return scale, beta - mean * scale


def _im2col(x, k, stride, pad):
    """x: [N,H,W,C] (bf16) -> ([N*Ho*Wo, k*k*C], Ho, Wo)."""
    N, H, W, C = x.shape
    xp = jnp.pad(x, ((0, 0), (pad, pad), (pad, pad), (0, 0)))
    Ho = (H + 2 * pad - k) // stride + 1
    Wo = (W + 2 * pad - k) // stride + 1
    parts = []
    for dy in range(k):
        for dx in range(k):
            parts.append(xp[:, dy:dy + stride * Ho:stride,
                            dx:dx + stride * Wo:stride, :])
    cols = jnp.stack(parts, axis=3).reshape(N * Ho * Wo, k * k * C)
    return cols, Ho, Wo


def conv_bn_layer(feat, w_torch, bias, gamma, beta):
    """Conv2d(k3,s2,p1) -> LeakyReLU -> BatchNorm (training-mode batch stats).

    Returns (bn output [N,Ho,Wo,Co] bf16, (mean,var) of that output — used as
    the skip's statistics by the up-path BN)."""
    N = feat.shape[0]
    Co, Ci = w_torch.shape[0], w_torch.shape[1]
    w_mat = jnp.transpose(w_torch, (2, 3, 1, 0)).reshape(9 * Ci, Co)
    cols, Ho, Wo = _im2col(feat, 3, 2, 1)
    M = cols.shape[0]
    y, st = gemm_lrelu_stats(cols[None], w_mat[None], bias, apply_lrelu=True)
    mean, var = _finalize_stats(st, M)
    scale, shift = _bn_scale_shift(gamma, beta, mean, var)
    z = bn_apply(y[0], scale, shift)
    # Skip statistics derived analytically: z = y*scale + shift (per channel)
    # so mean_z = mean*scale + shift and var_z = var*scale^2 (exact).
    zmean = mean * scale + shift
    zvar = var * scale * scale
    return z.reshape(N, Ho, Wo, Co), (zmean, zvar)


# ConvTranspose2d(k=4, s=2, p=1) phase decomposition: output phase 0 uses
# kernel taps {3,1} at padded offsets {0,1}; phase 1 uses taps {2,0} at {1,2}.
_PHASE_TAPS = (((0, 3), (1, 1)),
               ((1, 2), (2, 0)))


def conv_transpose_lrelu(feat, w_torch, bias):
    """ConvTranspose2d(k4,s2,p1) -> LeakyReLU via 4 phase GEMMs in one call.

    feat: [N,H,W,Ci] bf16; w_torch: [Ci,Co,4,4] (PyTorch ConvTranspose layout).
    Returns (out [N,2H,2W,Co] bf16, mean, var) — batch stats of the activation."""
    N, H, W, Ci = feat.shape
    Co = w_torch.shape[1]
    xp = jnp.pad(feat, ((0, 0), (1, 1), (1, 1), (0, 0)))
    cols_list, w_list = [], []
    for py in range(2):
        for px in range(2):
            parts, wparts = [], []
            for offy, dy in _PHASE_TAPS[py]:
                for offx, dx in _PHASE_TAPS[px]:
                    parts.append(xp[:, offy:offy + H, offx:offx + W, :])
                    wparts.append(w_torch[:, :, dy, dx])
            cols_list.append(jnp.stack(parts, axis=3).reshape(N * H * W, 4 * Ci))
            w_list.append(jnp.stack(wparts, axis=0).reshape(4 * Ci, Co))
    cols = jnp.stack(cols_list, axis=0)      # [4, N*H*W, 4*Ci]
    wmats = jnp.stack(w_list, axis=0)        # [4, 4*Ci, Co]
    y, st = gemm_lrelu_stats(cols, wmats, bias, apply_lrelu=True)
    mean, var = _finalize_stats(st, 4 * N * H * W)
    # interleave phases: out[n, 2h+py, 2w+px, c] = y[py,px, n,h,w, c]
    y = y.reshape(2, 2, N, H, W, Co)
    out = jnp.transpose(y, (2, 3, 0, 4, 1, 5)).reshape(N, 2 * H, 2 * W, Co)
    return out, mean, var


# --------------------------------------------------------------------------
# Net2D parameters + forward (do_bn=True path, training-mode batch statistics)
# --------------------------------------------------------------------------
def init_params(key, in_chans, mid_chans, out_chans):
    down_in = [in_chans, mid_chans, 2 * mid_chans]
    down_out = [mid_chans, 2 * mid_chans, 4 * mid_chans]
    up_in = [4 * mid_chans, 6 * mid_chans]
    up_out = [4 * mid_chans, 2 * mid_chans]
    up_bn = [6 * mid_chans, 3 * mid_chans]

    params = {}
    keys = iter(jax.random.split(key, 16))

    for i, (ci, co) in enumerate(zip(down_in, down_out)):
        params[f"down{i}_w"] = (jax.random.normal(next(keys), (co, ci, 3, 3))
                                / jnp.sqrt(9 * ci)).astype(jnp.float32)
        params[f"down{i}_b"] = jnp.full((co,), 0.01, jnp.float32)
        params[f"down{i}_g"] = jnp.ones((co,), jnp.float32)
        params[f"down{i}_beta"] = jnp.zeros((co,), jnp.float32)

    for i, (ci, co) in enumerate(zip(up_in, up_out)):
        # PyTorch ConvTranspose2d weight layout: [Cin, Cout, k, k]
        params[f"up{i}_w"] = (jax.random.normal(next(keys), (ci, co, 4, 4))
                              / jnp.sqrt(16 * ci)).astype(jnp.float32)
        params[f"up{i}_b"] = jnp.full((co,), 0.01, jnp.float32)

    for i, c in enumerate(up_bn):
        params[f"upbn{i}_g"] = jnp.ones((c,), jnp.float32)
        params[f"upbn{i}_beta"] = jnp.zeros((c,), jnp.float32)

    ci, co = 3 * mid_chans, out_chans
    # 1x1 conv stored as a [Cin, Cout] matrix (== torch w[:, :, 0, 0].T)
    params["final_w"] = (jax.random.normal(next(keys), (ci, co))
                         / jnp.sqrt(ci)).astype(jnp.float32)
    params["final_b"] = jnp.zeros((co,), jnp.float32)
    return params


def net2d_forward(params, x_nchw):
    # NCHW (PyTorch) -> NHWC, bf16 activations (all accumulation stays f32).
    feat = jnp.transpose(x_nchw, (0, 2, 3, 1)).astype(jnp.bfloat16)

    # --- down path: Conv(3,s2,p1) -> LeakyReLU -> BN; keep skips + their stats
    skips = []
    for i in range(3):
        feat, zstats = conv_bn_layer(feat, params[f"down{i}_w"],
                                     params[f"down{i}_b"],
                                     params[f"down{i}_g"],
                                     params[f"down{i}_beta"])
        skips.append((feat, zstats))
    skips.pop()  # drop the deepest feature (it is `feat` itself)

    # --- up path: ConvT(4,s2,p1) -> LeakyReLU -> [concat skip -> BN] fused;
    #     the last stage folds the BN into the final 1x1 conv, so the largest
    #     activation never round-trips HBM.
    out = None
    for i in range(2):
        a, mean_a, var_a = conv_transpose_lrelu(feat, params[f"up{i}_w"],
                                                params[f"up{i}_b"])
        skip, (mean_b, var_b) = skips.pop()
        N2, Ho, Wo, Ca = a.shape
        Cb = skip.shape[-1]
        mean = jnp.concatenate([mean_a, mean_b])
        var = jnp.concatenate([var_a, var_b])
        scale, shift = _bn_scale_shift(params[f"upbn{i}_g"],
                                       params[f"upbn{i}_beta"], mean, var)
        a2d = a.reshape(-1, Ca)
        b2d = skip.reshape(-1, Cb)
        if i == 0:
            c2d = bn_concat(a2d, b2d, scale, shift)
            feat = c2d.reshape(N2, Ho, Wo, Ca + Cb)
        else:
            o2d = concat_matmul_bnfold(a2d, b2d, scale, shift,
                                       params["final_w"], params["final_b"])
            out = o2d.reshape(N2, Ho, Wo, -1)

    # back to NCHW, f32
    return jnp.transpose(out, (0, 3, 1, 2))


if __name__ == "__main__":
    in_chans, mid_chans, out_chans = 4, 16, 1
    key = jax.random.PRNGKey(0)
    pkey, xkey = jax.random.split(key)

    params = init_params(pkey, in_chans, mid_chans, out_chans)
    x = jax.random.normal(xkey, (2, in_chans, 16, 16), jnp.float32)

    fwd = jax.jit(net2d_forward)
    out = jax.block_until_ready(fwd(params, x))

    # 16 -> 8 -> 4 -> 2 (down), 2 -> 4 -> 8 (up), fused 1x1 conv keeps 8x8.
    assert out.shape == (2, out_chans, 8, 8), out.shape
    assert out.dtype == jnp.float32
    assert bool(jnp.all(jnp.isfinite(out)))
    print("KERNEL_OK")
</pallas_src>

<mosaic_0001>
module attributes {stable_mosaic.version = 11 : i64} {
  func.func @_gemm_kernel(%arg0: i32, %arg1: i32, %arg2: memref<1x128x36xbf16, #tpu.memory_space<vmem>>, %arg3: memref<1x36x16xbf16, #tpu.memory_space<vmem>>, %arg4: memref<1x16xf32, #tpu.memory_space<vmem>>, %arg5: memref<1x128x16xbf16, #tpu.memory_space<vmem>>, %arg6: memref<1x1x8x16xf32, #tpu.memory_space<vmem>>) attributes {dimension_semantics = [#tpu.dimension_semantics<parallel>, #tpu.dimension_semantics<parallel>], iteration_bounds = array<i64: 1, 1>, scalar_prefetch = 0 : i64, scratch_operands = 0 : i64, tpu.core_type = #tpu.core_type<tc>, window_params = [{transform_indices = @transform_0, window_bounds = array<i64: 1, 128, 36>}, {transform_indices = @transform_1, window_bounds = array<i64: 1, 36, 16>}, {pipeline_mode = #tpu.pipeline_mode<synchronous>, transform_indices = @transform_2, window_bounds = array<i64: 1, 16>}, {transform_indices = @transform_3, window_bounds = array<i64: 1, 128, 16>}, {transform_indices = @transform_4, window_bounds = array<i64: 1, 1, 8, 16>}]} {
    %c0 = arith.constant 0 : index
    %c0_0 = arith.constant 0 : index
    %c0_1 = arith.constant 0 : index
    %0 = vector.load %arg2[%c0, %c0_0, %c0_1] : memref<1x128x36xbf16, #tpu.memory_space<vmem>>, vector<1x128x36xbf16>
    %1 = vector.shape_cast %0 : vector<1x128x36xbf16> to vector<128x36xbf16>
    %c0_2 = arith.constant 0 : index
    %c0_3 = arith.constant 0 : index
    %c0_4 = arith.constant 0 : index
    %2 = vector.load %arg3[%c0_2, %c0_3, %c0_4] : memref<1x36x16xbf16, #tpu.memory_space<vmem>>, vector<1x36x16xbf16>
    %3 = vector.shape_cast %2 : vector<1x36x16xbf16> to vector<36x16xbf16>
    %cst = arith.constant dense<0.000000e+00> : vector<128x16xf32>
    %4 = tpu.matmul %1, %3, %cst {dimension_numbers = #tpu.dot_dimension_numbers<[1], [0], [0], [1], [0, 0, 1, 1], [], []>} : vector<128x36xbf16>, vector<36x16xbf16>, vector<128x16xf32> -> vector<128x16xf32>
    %c0_5 = arith.constant 0 : index
    %c0_6 = arith.constant 0 : index
    %5 = vector.load %arg4[%c0_5, %c0_6] : memref<1x16xf32, #tpu.memory_space<vmem>>, vector<1x16xf32>
    %6 = vector.broadcast %5 : vector<1x16xf32> to vector<128x16xf32>
    %7 = arith.addf %4, %6 : vector<128x16xf32>
    %cst_7 = arith.constant 0.000000e+00 : f32
    %8 = vector.broadcast %cst_7 : f32 to vector<128x16xf32>
    %9 = arith.cmpf oge, %7, %8 : vector<128x16xf32>
    %cst_8 = arith.constant 0.00999999977 : f32
    %10 = vector.broadcast %cst_8 : f32 to vector<128x16xf32>
    %11 = arith.mulf %10, %7 : vector<128x16xf32>
    %12 = arith.select %9, %7, %11 : vector<128x16xi1>, vector<128x16xf32>
    %13 = arith.truncf %12 : vector<128x16xf32> to vector<128x16xbf16>
    %14 = vector.shape_cast %13 : vector<128x16xbf16> to vector<1x128x16xbf16>
    %c0_9 = arith.constant 0 : index
    %c0_10 = arith.constant 0 : index
    %c0_11 = arith.constant 0 : index
    %15 = vector.load %arg5[%c0_9, %c0_10, %c0_11] : memref<1x128x16xbf16, #tpu.memory_space<vmem>>, vector<1x128x16xbf16>
    tpu.vector_store %arg5[%c0_9, %c0_10, %c0_11], %14 {strides = array<i32>} : memref<1x128x16xbf16, #tpu.memory_space<vmem>>, vector<1x128x16xbf16>,
    %c128_i32 = arith.constant 128 : i32
    %16 = arith.muli %arg1, %c128_i32 : i32
    %17 = tpu.iota {dimensions = array<i32: 0>} : vector<128x1xi32>
    %18 = vector.broadcast %16 : i32 to vector<128x1xi32>
    %19 = arith.addi %18, %17 : vector<128x1xi32>
    %c128_i32_12 = arith.constant 128 : i32
    %20 = vector.broadcast %c128_i32_12 : i32 to vector<128x1xi32>
    %21 = arith.cmpi slt, %19, %20 : vector<128x1xi32>
    %cst_13 = arith.constant 0.000000e+00 : f32
    %22 = vector.shape_cast %21 : vector<128x1xi1> to vector<128x1xi1>
    %23 = vector.broadcast %22 : vector<128x1xi1> to vector<128x16xi1>
    %24 = vector.broadcast %cst_13 : f32 to vector<128x16xf32>
    %25 = arith.select %23, %12, %24 : vector<128x16xi1>, vector<128x16xf32>
    %cst_14 = arith.constant dense<0.000000e+00> : vector<16xf32>
    %26 = vector.multi_reduction <add>, %25, %cst_14 [0] : vector<128x16xf32> to vector<16xf32>
    %27 = vector.shape_cast %26 : vector<16xf32> to vector<1x16xf32>
    %28 = arith.mulf %25, %25 : vector<128x16xf32>
    %cst_15 = arith.constant dense<0.000000e+00> : vector<16xf32>
    %29 = vector.multi_reduction <add>, %28, %cst_15 [0] : vector<128x16xf32> to vector<16xf32>
    %30 = vector.shape_cast %29 : vector<16xf32> to vector<1x16xf32>
    %31 = tpu.iota {dimensions = array<i32: 0>} : vector<8x16xi32>
    %c0_i32 = arith.constant 0 : i32
    %32 = vector.broadcast %c0_i32 : i32 to vector<8x16xi32>
    %33 = arith.cmpi eq, %31, %32 : vector<8x16xi32>
    %34 = vector.shape_cast %27 : vector<1x16xf32> to vector<1x16xf32>
    %35 = vector.broadcast %34 : vector<1x16xf32> to vector<8x16xf32>
    %c1_i32 = arith.constant 1 : i32
    %36 = vector.broadcast %c1_i32 : i32 to vector<8x16xi32>
    %37 = arith.cmpi eq, %31, %36 : vector<8x16xi32>
    %38 = vector.shape_cast %30 : vector<1x16xf32> to vector<1x16xf32>
    %39 = vector.broadcast %38 : vector<1x16xf32> to vector<8x16xf32>
    %cst_16 = arith.constant 0.000000e+00 : f32
    %40 = vector.broadcast %cst_16 : f32 to vector<8x16xf32>
    %41 = arith.select %37, %39, %40 : vector<8x16xi1>, vector<8x16xf32>
    %42 = arith.select %33, %35, %41 : vector<8x16xi1>, vector<8x16xf32>
    %43 = vector.shape_cast %42 : vector<8x16xf32> to vector<1x1x8x16xf32>
    %c0_17 = arith.constant 0 : index
    %c0_18 = arith.constant 0 : index
    %c0_19 = arith.constant 0 : index
    %c0_20 = arith.constant 0 : index
    %44 = vector.load %arg6[%c0_17, %c0_18, %c0_19, %c0_20] : memref<1x1x8x16xf32, #tpu.memory_space<vmem>>, vector<1x1x8x16xf32>
    tpu.vector_store %arg6[%c0_17, %c0_18, %c0_19, %c0_20], %43 {strides = array<i32>} : memref<1x1x8x16xf32, #tpu.memory_space<vmem>>, vector<1x1x8x16xf32>,
    return
  }
  func.func @transform_0(%arg0: i32, %arg1: i32) -> (i32, i32, i32) {
    %c0_i32 = arith.constant 0 : i32
    %c0_i32_0 = arith.constant 0 : i32
    return %arg0, %arg1, %c0_i32 : i32, i32, i32
  }
  func.func @transform_1(%arg0: i32, %arg1: i32) -> (i32, i32, i32) {
    %c0_i32 = arith.constant 0 : i32
    %c0_i32_0 = arith.constant 0 : i32
    %c0_i32_1 = arith.constant 0 : i32
    return %arg0, %c0_i32, %c0_i32_0 : i32, i32, i32
  }
  func.func @transform_2(%arg0: i32, %arg1: i32) -> (i32, i32) {
    %c0_i32 = arith.constant 0 : i32
    %c0_i32_0 = arith.constant 0 : i32
    %c0_i32_1 = arith.constant 0 : i32
    return %c0_i32, %c0_i32_0 : i32, i32
  }
  func.func @transform_3(%arg0: i32, %arg1: i32) -> (i32, i32, i32) {
    %c0_i32 = arith.constant 0 : i32
    %c0_i32_0 = arith.constant 0 : i32
    return %arg0, %arg1, %c0_i32 : i32, i32, i32
  }
  func.func @transform_4(%arg0: i32, %arg1: i32) -> (i32, i32, i32, i32) {
    %c0_i32 = arith.constant 0 : i32
    %c0_i32_0 = arith.constant 0 : i32
    %c0_i32_1 = arith.constant 0 : i32
    return %arg0, %arg1, %c0_i32, %c0_i32_0 : i32, i32, i32, i32
  }
}

module attributes {stable_mosaic.version = 11 : i64} {
  func.func @_bn_apply_kernel(%arg0: i32, %arg1: memref<128x16xbf16, #tpu.memory_space<vmem>>, %arg2: memref<1x16xf32, #tpu.memory_space<vmem>>, %arg3: memref<1x16xf32, #tpu.memory_space<vmem>>, %arg4: memref<128x16xbf16, #tpu.memory_space<vmem>>) attributes {dimension_semantics = [#tpu.dimension_semantics<parallel>], iteration_bounds = array<i64: 1>, scalar_prefetch = 0 : i64, scratch_operands = 0 : i64, tpu.core_type = #tpu.core_type<tc>, window_params = [{transform_indices = @transform_0, window_bounds = array<i64: 128, 16>}, {pipeline_mode = #tpu.pipeline_mode<synchronous>, transform_indices = @transform_1, window_bounds = array<i64: 1, 16>}, {pipeline_mode = #tpu.pipeline_mode<synchronous>, transform_indices = @transform_2, window_bounds = array<i64: 1, 16>}, {transform_indices = @transform_3, window_bounds = array<i64: 128, 16>}]} {
    %c0 = arith.constant 0 : index
    %c0_0 = arith.constant 0 : index
    %0 = vector.load %arg1[%c0, %c0_0] : memref<128x16xbf16, #tpu.memory_space<vmem>>, vector<128x16xbf16>
    %1 = arith.extf %0 : vector<128x16xbf16> to vector<128x16xf32>
    %c0_1 = arith.constant 0 : index
    %c0_2 = arith.constant 0 : index
    %2 = vector.load %arg2[%c0_1, %c0_2] : memref<1x16xf32, #tpu.memory_space<vmem>>, vector<1x16xf32>
    %3 = vector.broadcast %2 : vector<1x16xf32> to vector<128x16xf32>
    %4 = arith.mulf %1, %3 : vector<128x16xf32>
    %c0_3 = arith.constant 0 : index
    %c0_4 = arith.constant 0 : index
    %5 = vector.load %arg3[%c0_3, %c0_4] : memref<1x16xf32, #tpu.memory_space<vmem>>, vector<1x16xf32>
    %6 = vector.broadcast %5 : vector<1x16xf32> to vector<128x16xf32>
    %7 = arith.addf %4, %6 : vector<128x16xf32>
    %8 = arith.truncf %7 : vector<128x16xf32> to vector<128x16xbf16>
    %c0_5 = arith.constant 0 : index
    %c0_6 = arith.constant 0 : index
    %9 = vector.load %arg4[%c0_5, %c0_6] : memref<128x16xbf16, #tpu.memory_space<vmem>>, vector<128x16xbf16>
    tpu.vector_store %arg4[%c0_5, %c0_6], %8 {strides = array<i32>} : memref<128x16xbf16, #tpu.memory_space<vmem>>, vector<128x16xbf16>,
    return
  }
  func.func @transform_0(%arg0: i32) -> (i32, i32) {
    %c0_i32 = arith.constant 0 : i32
    %c0_i32_0 = arith.constant 0 : i32
    return %arg0, %c0_i32 : i32, i32
  }
  func.func @transform_1(%arg0: i32) -> (i32, i32) {
    %c0_i32 = arith.constant 0 : i32
    %c0_i32_0 = arith.constant 0 : i32
    %c0_i32_1 = arith.constant 0 : i32
    return %c0_i32, %c0_i32_0 : i32, i32
  }
  func.func @transform_2(%arg0: i32) -> (i32, i32) {
    %c0_i32 = arith.constant 0 : i32
    %c0_i32_0 = arith.constant 0 : i32
    %c0_i32_1 = arith.constant 0 : i32
    return %c0_i32, %c0_i32_0 : i32, i32
  }
  func.func @transform_3(%arg0: i32) -> (i32, i32) {
    %c0_i32 = arith.constant 0 : i32
    %c0_i32_0 = arith.constant 0 : i32
    return %arg0, %c0_i32 : i32, i32
  }
}

module attributes {stable_mosaic.version = 11 : i64} {
  func.func @_bn_apply_kernel(%arg0: i32, %arg1: memref<32x32xbf16, #tpu.memory_space<vmem>>, %arg2: memref<1x32xf32, #tpu.memory_space<vmem>>, %arg3: memref<1x32xf32, #tpu.memory_space<vmem>>, %arg4: memref<32x32xbf16, #tpu.memory_space<vmem>>) attributes {dimension_semantics = [#tpu.dimension_semantics<parallel>], iteration_bounds = array<i64: 1>, scalar_prefetch = 0 : i64, scratch_operands = 0 : i64, tpu.core_type = #tpu.core_type<tc>, window_params = [{transform_indices = @transform_0, window_bounds = array<i64: 32, 32>}, {pipeline_mode = #tpu.pipeline_mode<synchronous>, transform_indices = @transform_1, window_bounds = array<i64: 1, 32>}, {pipeline_mode = #tpu.pipeline_mode<synchronous>, transform_indices = @transform_2, window_bounds = array<i64: 1, 32>}, {transform_indices = @transform_3, window_bounds = array<i64: 32, 32>}]} {
    %c0 = arith.constant 0 : index
    %c0_0 = arith.constant 0 : index
    %0 = vector.load %arg1[%c0, %c0_0] : memref<32x32xbf16, #tpu.memory_space<vmem>>, vector<32x32xbf16>
    %1 = arith.extf %0 : vector<32x32xbf16> to vector<32x32xf32>
    %c0_1 = arith.constant 0 : index
    %c0_2 = arith.constant 0 : index
    %2 = vector.load %arg2[%c0_1, %c0_2] : memref<1x32xf32, #tpu.memory_space<vmem>>, vector<1x32xf32>
    %3 = vector.broadcast %2 : vector<1x32xf32> to vector<32x32xf32>
    %4 = arith.mulf %1, %3 : vector<32x32xf32>
    %c0_3 = arith.constant 0 : index
    %c0_4 = arith.constant 0 : index
    %5 = vector.load %arg3[%c0_3, %c0_4] : memref<1x32xf32, #tpu.memory_space<vmem>>, vector<1x32xf32>
    %6 = vector.broadcast %5 : vector<1x32xf32> to vector<32x32xf32>
    %7 = arith.addf %4, %6 : vector<32x32xf32>
    %8 = arith.truncf %7 : vector<32x32xf32> to vector<32x32xbf16>
    %c0_5 = arith.constant 0 : index
    %c0_6 = arith.constant 0 : index
    %9 = vector.load %arg4[%c0_5, %c0_6] : memref<32x32xbf16, #tpu.memory_space<vmem>>, vector<32x32xbf16>
    tpu.vector_store %arg4[%c0_5, %c0_6], %8 {strides = array<i32>} : memref<32x32xbf16, #tpu.memory_space<vmem>>, vector<32x32xbf16>,
    return
  }
  func.func @transform_0(%arg0: i32) -> (i32, i32) {
    %c0_i32 = arith.constant 0 : i32
    %c0_i32_0 = arith.constant 0 : i32
    return %arg0, %c0_i32 : i32, i32
  }
  func.func @transform_1(%arg0: i32) -> (i32, i32) {
    %c0_i32 = arith.constant 0 : i32
    %c0_i32_0 = arith.constant 0 : i32
    %c0_i32_1 = arith.constant 0 : i32
    return %c0_i32, %c0_i32_0 : i32, i32
  }
  func.func @transform_2(%arg0: i32) -> (i32, i32) {
    %c0_i32 = arith.constant 0 : i32
    %c0_i32_0 = arith.constant 0 : i32
    %c0_i32_1 = arith.constant 0 : i32
    return %c0_i32, %c0_i32_0 : i32, i32
  }
  func.func @transform_3(%arg0: i32) -> (i32, i32) {
    %c0_i32 = arith.constant 0 : i32
    %c0_i32_0 = arith.constant 0 : i32
    return %arg0, %c0_i32 : i32, i32
  }
}

module attributes {stable_mosaic.version = 11 : i64} {
  func.func @_gemm_kernel(%arg0: i32, %arg1: i32, %arg2: memref<1x32x144xbf16, #tpu.memory_space<vmem>>, %arg3: memref<1x144x32xbf16, #tpu.memory_space<vmem>>, %arg4: memref<1x32xf32, #tpu.memory_space<vmem>>, %arg5: memref<1x32x32xbf16, #tpu.memory_space<vmem>>, %arg6: memref<1x1x8x32xf32, #tpu.memory_space<vmem>>) attributes {dimension_semantics = [#tpu.dimension_semantics<parallel>, #tpu.dimension_semantics<parallel>], iteration_bounds = array<i64: 1, 1>, scalar_prefetch = 0 : i64, scratch_operands = 0 : i64, tpu.core_type = #tpu.core_type<tc>, window_params = [{transform_indices = @transform_0, window_bounds = array<i64: 1, 32, 144>}, {transform_indices = @transform_1, window_bounds = array<i64: 1, 144, 32>}, {pipeline_mode = #tpu.pipeline_mode<synchronous>, transform_indices = @transform_2, window_bounds = array<i64: 1, 32>}, {transform_indices = @transform_3, window_bounds = array<i64: 1, 32, 32>}, {transform_indices = @transform_4, window_bounds = array<i64: 1, 1, 8, 32>}]} {
    %c0 = arith.constant 0 : index
    %c0_0 = arith.constant 0 : index
    %c0_1 = arith.constant 0 : index
    %0 = vector.load %arg2[%c0, %c0_0, %c0_1] : memref<1x32x144xbf16, #tpu.memory_space<vmem>>, vector<1x32x144xbf16>
    %1 = vector.shape_cast %0 : vector<1x32x144xbf16> to vector<32x144xbf16>
    %c0_2 = arith.constant 0 : index
    %c0_3 = arith.constant 0 : index
    %c0_4 = arith.constant 0 : index
    %2 = vector.load %arg3[%c0_2, %c0_3, %c0_4] : memref<1x144x32xbf16, #tpu.memory_space<vmem>>, vector<1x144x32xbf16>
    %3 = vector.shape_cast %2 : vector<1x144x32xbf16> to vector<144x32xbf16>
    %cst = arith.constant dense<0.000000e+00> : vector<32x32xf32>
    %4 = tpu.matmul %1, %3, %cst {dimension_numbers = #tpu.dot_dimension_numbers<[1], [0], [0], [1], [0, 0, 1, 1], [], []>} : vector<32x144xbf16>, vector<144x32xbf16>, vector<32x32xf32> -> vector<32x32xf32>
    %c0_5 = arith.constant 0 : index
    %c0_6 = arith.constant 0 : index
    %5 = vector.load %arg4[%c0_5, %c0_6] : memref<1x32xf32, #tpu.memory_space<vmem>>, vector<1x32xf32>
    %6 = vector.broadcast %5 : vector<1x32xf32> to vector<32x32xf32>
    %7 = arith.addf %4, %6 : vector<32x32xf32>
    %cst_7 = arith.constant 0.000000e+00 : f32
    %8 = vector.broadcast %cst_7 : f32 to vector<32x32xf32>
    %9 = arith.cmpf oge, %7, %8 : vector<32x32xf32>
    %cst_8 = arith.constant 0.00999999977 : f32
    %10 = vector.broadcast %cst_8 : f32 to vector<32x32xf32>
    %11 = arith.mulf %10, %7 : vector<32x32xf32>
    %12 = arith.select %9, %7, %11 : vector<32x32xi1>, vector<32x32xf32>
    %13 = arith.truncf %12 : vector<32x32xf32> to vector<32x32xbf16>
    %14 = vector.shape_cast %13 : vector<32x32xbf16> to vector<1x32x32xbf16>
    %c0_9 = arith.constant 0 : index
    %c0_10 = arith.constant 0 : index
    %c0_11 = arith.constant 0 : index
    %15 = vector.load %arg5[%c0_9, %c0_10, %c0_11] : memref<1x32x32xbf16, #tpu.memory_space<vmem>>, vector<1x32x32xbf16>
    tpu.vector_store %arg5[%c0_9, %c0_10, %c0_11], %14 {strides = array<i32>} : memref<1x32x32xbf16, #tpu.memory_space<vmem>>, vector<1x32x32xbf16>,
    %c32_i32 = arith.constant 32 : i32
    %16 = arith.muli %arg1, %c32_i32 : i32
    %17 = tpu.iota {dimensions = array<i32: 0>} : vector<32x1xi32>
    %18 = vector.broadcast %16 : i32 to vector<32x1xi32>
    %19 = arith.addi %18, %17 : vector<32x1xi32>
    %c32_i32_12 = arith.constant 32 : i32
    %20 = vector.broadcast %c32_i32_12 : i32 to vector<32x1xi32>
    %21 = arith.cmpi slt, %19, %20 : vector<32x1xi32>
    %cst_13 = arith.constant 0.000000e+00 : f32
    %22 = vector.shape_cast %21 : vector<32x1xi1> to vector<32x1xi1>
    %23 = vector.broadcast %22 : vector<32x1xi1> to vector<32x32xi1>
    %24 = vector.broadcast %cst_13 : f32 to vector<32x32xf32>
    %25 = arith.select %23, %12, %24 : vector<32x32xi1>, vector<32x32xf32>
    %cst_14 = arith.constant dense<0.000000e+00> : vector<32xf32>
    %26 = vector.multi_reduction <add>, %25, %cst_14 [0] : vector<32x32xf32> to vector<32xf32>
    %27 = vector.shape_cast %26 : vector<32xf32> to vector<1x32xf32>
    %28 = arith.mulf %25, %25 : vector<32x32xf32>
    %cst_15 = arith.constant dense<0.000000e+00> : vector<32xf32>
    %29 = vector.multi_reduction <add>, %28, %cst_15 [0] : vector<32x32xf32> to vector<32xf32>
    %30 = vector.shape_cast %29 : vector<32xf32> to vector<1x32xf32>
    %31 = tpu.iota {dimensions = array<i32: 0>} : vector<8x32xi32>
    %c0_i32 = arith.constant 0 : i32
    %32 = vector.broadcast %c0_i32 : i32 to vector<8x32xi32>
    %33 = arith.cmpi eq, %31, %32 : vector<8x32xi32>
    %34 = vector.shape_cast %27 : vector<1x32xf32> to vector<1x32xf32>
    %35 = vector.broadcast %34 : vector<1x32xf32> to vector<8x32xf32>
    %c1_i32 = arith.constant 1 : i32
    %36 = vector.broadcast %c1_i32 : i32 to vector<8x32xi32>
    %37 = arith.cmpi eq, %31, %36 : vector<8x32xi32>
    %38 = vector.shape_cast %30 : vector<1x32xf32> to vector<1x32xf32>
    %39 = vector.broadcast %38 : vector<1x32xf32> to vector<8x32xf32>
    %cst_16 = arith.constant 0.000000e+00 : f32
    %40 = vector.broadcast %cst_16 : f32 to vector<8x32xf32>
    %41 = arith.select %37, %39, %40 : vector<8x32xi1>, vector<8x32xf32>
    %42 = arith.select %33, %35, %41 : vector<8x32xi1>, vector<8x32xf32>
    %43 = vector.shape_cast %42 : vector<8x32xf32> to vector<1x1x8x32xf32>
    %c0_17 = arith.constant 0 : index
    %c0_18 = arith.constant 0 : index
    %c0_19 = arith.constant 0 : index
    %c0_20 = arith.constant 0 : index
    %44 = vector.load %arg6[%c0_17, %c0_18, %c0_19, %c0_20] : memref<1x1x8x32xf32, #tpu.memory_space<vmem>>, vector<1x1x8x32xf32>
    tpu.vector_store %arg6[%c0_17, %c0_18, %c0_19, %c0_20], %43 {strides = array<i32>} : memref<1x1x8x32xf32, #tpu.memory_space<vmem>>, vector<1x1x8x32xf32>,
    return
  }
  func.func @transform_0(%arg0: i32, %arg1: i32) -> (i32, i32, i32) {
    %c0_i32 = arith.constant 0 : i32
    %c0_i32_0 = arith.constant 0 : i32
    return %arg0, %arg1, %c0_i32 : i32, i32, i32
  }
  func.func @transform_1(%arg0: i32, %arg1: i32) -> (i32, i32, i32) {
    %c0_i32 = arith.constant 0 : i32
    %c0_i32_0 = arith.constant 0 : i32
    %c0_i32_1 = arith.constant 0 : i32
    return %arg0, %c0_i32, %c0_i32_0 : i32, i32, i32
  }
  func.func @transform_2(%arg0: i32, %arg1: i32) -> (i32, i32) {
    %c0_i32 = arith.constant 0 : i32
    %c0_i32_0 = arith.constant 0 : i32
    %c0_i32_1 = arith.constant 0 : i32
    return %c0_i32, %c0_i32_0 : i32, i32
  }
  func.func @transform_3(%arg0: i32, %arg1: i32) -> (i32, i32, i32) {
    %c0_i32 = arith.constant 0 : i32
    %c0_i32_0 = arith.constant 0 : i32
    return %arg0, %arg1, %c0_i32 : i32, i32, i32
  }
  func.func @transform_4(%arg0: i32, %arg1: i32) -> (i32, i32, i32, i32) {
    %c0_i32 = arith.constant 0 : i32
    %c0_i32_0 = arith.constant 0 : i32
    %c0_i32_1 = arith.constant 0 : i32
    return %arg0, %arg1, %c0_i32, %c0_i32_0 : i32, i32, i32, i32
  }
}

module attributes {stable_mosaic.version = 11 : i64} {
  func.func @_gemm_kernel(%arg0: i32, %arg1: i32, %arg2: memref<1x8x288xbf16, #tpu.memory_space<vmem>>, %arg3: memref<1x288x64xbf16, #tpu.memory_space<vmem>>, %arg4: memref<1x64xf32, #tpu.memory_space<vmem>>, %arg5: memref<1x8x64xbf16, #tpu.memory_space<vmem>>, %arg6: memref<1x1x8x64xf32, #tpu.memory_space<vmem>>) attributes {dimension_semantics = [#tpu.dimension_semantics<parallel>, #tpu.dimension_semantics<parallel>], iteration_bounds = array<i64: 1, 1>, scalar_prefetch = 0 : i64, scratch_operands = 0 : i64, tpu.core_type = #tpu.core_type<tc>, window_params = [{transform_indices = @transform_0, window_bounds = array<i64: 1, 8, 288>}, {transform_indices = @transform_1, window_bounds = array<i64: 1, 288, 64>}, {pipeline_mode = #tpu.pipeline_mode<synchronous>, transform_indices = @transform_2, window_bounds = array<i64: 1, 64>}, {transform_indices = @transform_3, window_bounds = array<i64: 1, 8, 64>}, {transform_indices = @transform_4, window_bounds = array<i64: 1, 1, 8, 64>}]} {
    %c0 = arith.constant 0 : index
    %c0_0 = arith.constant 0 : index
    %c0_1 = arith.constant 0 : index
    %0 = vector.load %arg2[%c0, %c0_0, %c0_1] : memref<1x8x288xbf16, #tpu.memory_space<vmem>>, vector<1x8x288xbf16>
    %1 = vector.shape_cast %0 : vector<1x8x288xbf16> to vector<8x288xbf16>
    %c0_2 = arith.constant 0 : index
    %c0_3 = arith.constant 0 : index
    %c0_4 = arith.constant 0 : index
    %2 = vector.load %arg3[%c0_2, %c0_3, %c0_4] : memref<1x288x64xbf16, #tpu.memory_space<vmem>>, vector<1x288x64xbf16>
    %3 = vector.shape_cast %2 : vector<1x288x64xbf16> to vector<288x64xbf16>
    %cst = arith.constant dense<0.000000e+00> : vector<8x64xf32>
    %4 = tpu.matmul %1, %3, %cst {dimension_numbers = #tpu.dot_dimension_numbers<[1], [0], [0], [1], [0, 0, 1, 1], [], []>} : vector<8x288xbf16>, vector<288x64xbf16>, vector<8x64xf32> -> vector<8x64xf32>
    %c0_5 = arith.constant 0 : index
    %c0_6 = arith.constant 0 : index
    %5 = vector.load %arg4[%c0_5, %c0_6] : memref<1x64xf32, #tpu.memory_space<vmem>>, vector<1x64xf32>
    %6 = vector.broadcast %5 : vector<1x64xf32> to vector<8x64xf32>
    %7 = arith.addf %4, %6 : vector<8x64xf32>
    %cst_7 = arith.constant 0.000000e+00 : f32
    %8 = vector.broadcast %cst_7 : f32 to vector<8x64xf32>
    %9 = arith.cmpf oge, %7, %8 : vector<8x64xf32>
    %cst_8 = arith.constant 0.00999999977 : f32
    %10 = vector.broadcast %cst_8 : f32 to vector<8x64xf32>
    %11 = arith.mulf %10, %7 : vector<8x64xf32>
    %12 = arith.select %9, %7, %11 : vector<8x64xi1>, vector<8x64xf32>
    %13 = arith.truncf %12 : vector<8x64xf32> to vector<8x64xbf16>
    %14 = vector.shape_cast %13 : vector<8x64xbf16> to vector<1x8x64xbf16>
    %c0_9 = arith.constant 0 : index
    %c0_10 = arith.constant 0 : index
    %c0_11 = arith.constant 0 : index
    %15 = vector.load %arg5[%c0_9, %c0_10, %c0_11] : memref<1x8x64xbf16, #tpu.memory_space<vmem>>, vector<1x8x64xbf16>
    tpu.vector_store %arg5[%c0_9, %c0_10, %c0_11], %14 {strides = array<i32>} : memref<1x8x64xbf16, #tpu.memory_space<vmem>>, vector<1x8x64xbf16>,
    %c8_i32 = arith.constant 8 : i32
    %16 = arith.muli %arg1, %c8_i32 : i32
    %17 = tpu.iota {dimensions = array<i32: 0>} : vector<8x1xi32>
    %18 = vector.broadcast %16 : i32 to vector<8x1xi32>
    %19 = arith.addi %18, %17 : vector<8x1xi32>
    %c8_i32_12 = arith.constant 8 : i32
    %20 = vector.broadcast %c8_i32_12 : i32 to vector<8x1xi32>
    %21 = arith.cmpi slt, %19, %20 : vector<8x1xi32>
    %cst_13 = arith.constant 0.000000e+00 : f32
    %22 = vector.shape_cast %21 : vector<8x1xi1> to vector<8x1xi1>
    %23 = vector.broadcast %22 : vector<8x1xi1> to vector<8x64xi1>
    %24 = vector.broadcast %cst_13 : f32 to vector<8x64xf32>
    %25 = arith.select %23, %12, %24 : vector<8x64xi1>, vector<8x64xf32>
    %cst_14 = arith.constant dense<0.000000e+00> : vector<64xf32>
    %26 = vector.multi_reduction <add>, %25, %cst_14 [0] : vector<8x64xf32> to vector<64xf32>
    %27 = vector.shape_cast %26 : vector<64xf32> to vector<1x64xf32>
    %28 = arith.mulf %25, %25 : vector<8x64xf32>
    %cst_15 = arith.constant dense<0.000000e+00> : vector<64xf32>
    %29 = vector.multi_reduction <add>, %28, %cst_15 [0] : vector<8x64xf32> to vector<64xf32>
    %30 = vector.shape_cast %29 : vector<64xf32> to vector<1x64xf32>
    %31 = tpu.iota {dimensions = array<i32: 0>} : vector<8x64xi32>
    %c0_i32 = arith.constant 0 : i32
    %32 = vector.broadcast %c0_i32 : i32 to vector<8x64xi32>
    %33 = arith.cmpi eq, %31, %32 : vector<8x64xi32>
    %34 = vector.shape_cast %27 : vector<1x64xf32> to vector<1x64xf32>
    %35 = vector.broadcast %34 : vector<1x64xf32> to vector<8x64xf32>
    %c1_i32 = arith.constant 1 : i32
    %36 = vector.broadcast %c1_i32 : i32 to vector<8x64xi32>
    %37 = arith.cmpi eq, %31, %36 : vector<8x64xi32>
    %38 = vector.shape_cast %30 : vector<1x64xf32> to vector<1x64xf32>
    %39 = vector.broadcast %38 : vector<1x64xf32> to vector<8x64xf32>
    %cst_16 = arith.constant 0.000000e+00 : f32
    %40 = vector.broadcast %cst_16 : f32 to vector<8x64xf32>
    %41 = arith.select %37, %39, %40 : vector<8x64xi1>, vector<8x64xf32>
    %42 = arith.select %33, %35, %41 : vector<8x64xi1>, vector<8x64xf32>
    %43 = vector.shape_cast %42 : vector<8x64xf32> to vector<1x1x8x64xf32>
    %c0_17 = arith.constant 0 : index
    %c0_18 = arith.constant 0 : index
    %c0_19 = arith.constant 0 : index
    %c0_20 = arith.constant 0 : index
    %44 = vector.load %arg6[%c0_17, %c0_18, %c0_19, %c0_20] : memref<1x1x8x64xf32, #tpu.memory_space<vmem>>, vector<1x1x8x64xf32>
    tpu.vector_store %arg6[%c0_17, %c0_18, %c0_19, %c0_20], %43 {strides = array<i32>} : memref<1x1x8x64xf32, #tpu.memory_space<vmem>>, vector<1x1x8x64xf32>,
    return
  }
  func.func @transform_0(%arg0: i32, %arg1: i32) -> (i32, i32, i32) {
    %c0_i32 = arith.constant 0 : i32
    %c0_i32_0 = arith.constant 0 : i32
    return %arg0, %arg1, %c0_i32 : i32, i32, i32
  }
  func.func @transform_1(%arg0: i32, %arg1: i32) -> (i32, i32, i32) {
    %c0_i32 = arith.constant 0 : i32
    %c0_i32_0 = arith.constant 0 : i32
    %c0_i32_1 = arith.constant 0 : i32
    return %arg0, %c0_i32, %c0_i32_0 : i32, i32, i32
  }
  func.func @transform_2(%arg0: i32, %arg1: i32) -> (i32, i32) {
    %c0_i32 = arith.constant 0 : i32
    %c0_i32_0 = arith.constant 0 : i32
    %c0_i32_1 = arith.constant 0 : i32
    return %c0_i32, %c0_i32_0 : i32, i32
  }
  func.func @transform_3(%arg0: i32, %arg1: i32) -> (i32, i32, i32) {
    %c0_i32 = arith.constant 0 : i32
    %c0_i32_0 = arith.constant 0 : i32
    return %arg0, %arg1, %c0_i32 : i32, i32, i32
  }
  func.func @transform_4(%arg0: i32, %arg1: i32) -> (i32, i32, i32, i32) {
    %c0_i32 = arith.constant 0 : i32
    %c0_i32_0 = arith.constant 0 : i32
    %c0_i32_1 = arith.constant 0 : i32
    return %arg0, %arg1, %c0_i32, %c0_i32_0 : i32, i32, i32, i32
  }
}

module attributes {stable_mosaic.version = 11 : i64} {
  func.func @_bn_apply_kernel(%arg0: i32, %arg1: memref<8x64xbf16, #tpu.memory_space<vmem>>, %arg2: memref<1x64xf32, #tpu.memory_space<vmem>>, %arg3: memref<1x64xf32, #tpu.memory_space<vmem>>, %arg4: memref<8x64xbf16, #tpu.memory_space<vmem>>) attributes {dimension_semantics = [#tpu.dimension_semantics<parallel>], iteration_bounds = array<i64: 1>, scalar_prefetch = 0 : i64, scratch_operands = 0 : i64, tpu.core_type = #tpu.core_type<tc>, window_params = [{transform_indices = @transform_0, window_bounds = array<i64: 8, 64>}, {pipeline_mode = #tpu.pipeline_mode<synchronous>, transform_indices = @transform_1, window_bounds = array<i64: 1, 64>}, {pipeline_mode = #tpu.pipeline_mode<synchronous>, transform_indices = @transform_2, window_bounds = array<i64: 1, 64>}, {transform_indices = @transform_3, window_bounds = array<i64: 8, 64>}]} {
    %c0 = arith.constant 0 : index
    %c0_0 = arith.constant 0 : index
    %0 = vector.load %arg1[%c0, %c0_0] : memref<8x64xbf16, #tpu.memory_space<vmem>>, vector<8x64xbf16>
    %1 = arith.extf %0 : vector<8x64xbf16> to vector<8x64xf32>
    %c0_1 = arith.constant 0 : index
    %c0_2 = arith.constant 0 : index
    %2 = vector.load %arg2[%c0_1, %c0_2] : memref<1x64xf32, #tpu.memory_space<vmem>>, vector<1x64xf32>
    %3 = vector.broadcast %2 : vector<1x64xf32> to vector<8x64xf32>
    %4 = arith.mulf %1, %3 : vector<8x64xf32>
    %c0_3 = arith.constant 0 : index
    %c0_4 = arith.constant 0 : index
    %5 = vector.load %arg3[%c0_3, %c0_4] : memref<1x64xf32, #tpu.memory_space<vmem>>, vector<1x64xf32>
    %6 = vector.broadcast %5 : vector<1x64xf32> to vector<8x64xf32>
    %7 = arith.addf %4, %6 : vector<8x64xf32>
    %8 = arith.truncf %7 : vector<8x64xf32> to vector<8x64xbf16>
    %c0_5 = arith.constant 0 : index
    %c0_6 = arith.constant 0 : index
    %9 = vector.load %arg4[%c0_5, %c0_6] : memref<8x64xbf16, #tpu.memory_space<vmem>>, vector<8x64xbf16>
    tpu.vector_store %arg4[%c0_5, %c0_6], %8 {strides = array<i32>} : memref<8x64xbf16, #tpu.memory_space<vmem>>, vector<8x64xbf16>,
    return
  }
  func.func @transform_0(%arg0: i32) -> (i32, i32) {
    %c0_i32 = arith.constant 0 : i32
    %c0_i32_0 = arith.constant 0 : i32
    return %arg0, %c0_i32 : i32, i32
  }
  func.func @transform_1(%arg0: i32) -> (i32, i32) {
    %c0_i32 = arith.constant 0 : i32
    %c0_i32_0 = arith.constant 0 : i32
    %c0_i32_1 = arith.constant 0 : i32
    return %c0_i32, %c0_i32_0 : i32, i32
  }
  func.func @transform_2(%arg0: i32) -> (i32, i32) {
    %c0_i32 = arith.constant 0 : i32
    %c0_i32_0 = arith.constant 0 : i32
    %c0_i32_1 = arith.constant 0 : i32
    return %c0_i32, %c0_i32_0 : i32, i32
  }
  func.func @transform_3(%arg0: i32) -> (i32, i32) {
    %c0_i32 = arith.constant 0 : i32
    %c0_i32_0 = arith.constant 0 : i32
    return %arg0, %c0_i32 : i32, i32
  }
}

module attributes {stable_mosaic.version = 11 : i64} {
  func.func @_gemm_kernel(%arg0: i32, %arg1: i32, %arg2: memref<1x8x256xbf16, #tpu.memory_space<vmem>>, %arg3: memref<1x256x64xbf16, #tpu.memory_space<vmem>>, %arg4: memref<1x64xf32, #tpu.memory_space<vmem>>, %arg5: memref<1x8x64xbf16, #tpu.memory_space<vmem>>, %arg6: memref<1x1x8x64xf32, #tpu.memory_space<vmem>>) attributes {dimension_semantics = [#tpu.dimension_semantics<parallel>, #tpu.dimension_semantics<parallel>], iteration_bounds = array<i64: 4, 1>, scalar_prefetch = 0 : i64, scratch_operands = 0 : i64, tpu.core_type = #tpu.core_type<tc>, window_params = [{transform_indices = @transform_0, window_bounds = array<i64: 1, 8, 256>}, {transform_indices = @transform_1, window_bounds = array<i64: 1, 256, 64>}, {pipeline_mode = #tpu.pipeline_mode<synchronous>, transform_indices = @transform_2, window_bounds = array<i64: 1, 64>}, {transform_indices = @transform_3, window_bounds = array<i64: 1, 8, 64>}, {transform_indices = @transform_4, window_bounds = array<i64: 1, 1, 8, 64>}]} {
    %c0 = arith.constant 0 : index
    %c0_0 = arith.constant 0 : index
    %c0_1 = arith.constant 0 : index
    %0 = vector.load %arg2[%c0, %c0_0, %c0_1] : memref<1x8x256xbf16, #tpu.memory_space<vmem>>, vector<1x8x256xbf16>
    %1 = vector.shape_cast %0 : vector<1x8x256xbf16> to vector<8x256xbf16>
    %c0_2 = arith.constant 0 : index
    %c0_3 = arith.constant 0 : index
    %c0_4 = arith.constant 0 : index
    %2 = vector.load %arg3[%c0_2, %c0_3, %c0_4] : memref<1x256x64xbf16, #tpu.memory_space<vmem>>, vector<1x256x64xbf16>
    %3 = vector.shape_cast %2 : vector<1x256x64xbf16> to vector<256x64xbf16>
    %cst = arith.constant dense<0.000000e+00> : vector<8x64xf32>
    %4 = tpu.matmul %1, %3, %cst {dimension_numbers = #tpu.dot_dimension_numbers<[1], [0], [0], [1], [0, 0, 1, 1], [], []>} : vector<8x256xbf16>, vector<256x64xbf16>, vector<8x64xf32> -> vector<8x64xf32>
    %c0_5 = arith.constant 0 : index
    %c0_6 = arith.constant 0 : index
    %5 = vector.load %arg4[%c0_5, %c0_6] : memref<1x64xf32, #tpu.memory_space<vmem>>, vector<1x64xf32>
    %6 = vector.broadcast %5 : vector<1x64xf32> to vector<8x64xf32>
    %7 = arith.addf %4, %6 : vector<8x64xf32>
    %cst_7 = arith.constant 0.000000e+00 : f32
    %8 = vector.broadcast %cst_7 : f32 to vector<8x64xf32>
    %9 = arith.cmpf oge, %7, %8 : vector<8x64xf32>
    %cst_8 = arith.constant 0.00999999977 : f32
    %10 = vector.broadcast %cst_8 : f32 to vector<8x64xf32>
    %11 = arith.mulf %10, %7 : vector<8x64xf32>
    %12 = arith.select %9, %7, %11 : vector<8x64xi1>, vector<8x64xf32>
    %13 = arith.truncf %12 : vector<8x64xf32> to vector<8x64xbf16>
    %14 = vector.shape_cast %13 : vector<8x64xbf16> to vector<1x8x64xbf16>
    %c0_9 = arith.constant 0 : index
    %c0_10 = arith.constant 0 : index
    %c0_11 = arith.constant 0 : index
    %15 = vector.load %arg5[%c0_9, %c0_10, %c0_11] : memref<1x8x64xbf16, #tpu.memory_space<vmem>>, vector<1x8x64xbf16>
    tpu.vector_store %arg5[%c0_9, %c0_10, %c0_11], %14 {strides = array<i32>} : memref<1x8x64xbf16, #tpu.memory_space<vmem>>, vector<1x8x64xbf16>,
    %c8_i32 = arith.constant 8 : i32
    %16 = arith.muli %arg1, %c8_i32 : i32
    %17 = tpu.iota {dimensions = array<i32: 0>} : vector<8x1xi32>
    %18 = vector.broadcast %16 : i32 to vector<8x1xi32>
    %19 = arith.addi %18, %17 : vector<8x1xi32>
    %c8_i32_12 = arith.constant 8 : i32
    %20 = vector.broadcast %c8_i32_12 : i32 to vector<8x1xi32>
    %21 = arith.cmpi slt, %19, %20 : vector<8x1xi32>
    %cst_13 = arith.constant 0.000000e+00 : f32
    %22 = vector.shape_cast %21 : vector<8x1xi1> to vector<8x1xi1>
    %23 = vector.broadcast %22 : vector<8x1xi1> to vector<8x64xi1>
    %24 = vector.broadcast %cst_13 : f32 to vector<8x64xf32>
    %25 = arith.select %23, %12, %24 : vector<8x64xi1>, vector<8x64xf32>
    %cst_14 = arith.constant dense<0.000000e+00> : vector<64xf32>
    %26 = vector.multi_reduction <add>, %25, %cst_14 [0] : vector<8x64xf32> to vector<64xf32>
    %27 = vector.shape_cast %26 : vector<64xf32> to vector<1x64xf32>
    %28 = arith.mulf %25, %25 : vector<8x64xf32>
    %cst_15 = arith.constant dense<0.000000e+00> : vector<64xf32>
    %29 = vector.multi_reduction <add>, %28, %cst_15 [0] : vector<8x64xf32> to vector<64xf32>
    %30 = vector.shape_cast %29 : vector<64xf32> to vector<1x64xf32>
    %31 = tpu.iota {dimensions = array<i32: 0>} : vector<8x64xi32>
    %c0_i32 = arith.constant 0 : i32
    %32 = vector.broadcast %c0_i32 : i32 to vector<8x64xi32>
    %33 = arith.cmpi eq, %31, %32 : vector<8x64xi32>
    %34 = vector.shape_cast %27 : vector<1x64xf32> to vector<1x64xf32>
    %35 = vector.broadcast %34 : vector<1x64xf32> to vector<8x64xf32>
    %c1_i32 = arith.constant 1 : i32
    %36 = vector.broadcast %c1_i32 : i32 to vector<8x64xi32>
    %37 = arith.cmpi eq, %31, %36 : vector<8x64xi32>
    %38 = vector.shape_cast %30 : vector<1x64xf32> to vector<1x64xf32>
    %39 = vector.broadcast %38 : vector<1x64xf32> to vector<8x64xf32>
    %cst_16 = arith.constant 0.000000e+00 : f32
    %40 = vector.broadcast %cst_16 : f32 to vector<8x64xf32>
    %41 = arith.select %37, %39, %40 : vector<8x64xi1>, vector<8x64xf32>
    %42 = arith.select %33, %35, %41 : vector<8x64xi1>, vector<8x64xf32>
    %43 = vector.shape_cast %42 : vector<8x64xf32> to vector<1x1x8x64xf32>
    %c0_17 = arith.constant 0 : index
    %c0_18 = arith.constant 0 : index
    %c0_19 = arith.constant 0 : index
    %c0_20 = arith.constant 0 : index
    %44 = vector.load %arg6[%c0_17, %c0_18, %c0_19, %c0_20] : memref<1x1x8x64xf32, #tpu.memory_space<vmem>>, vector<1x1x8x64xf32>
    tpu.vector_store %arg6[%c0_17, %c0_18, %c0_19, %c0_20], %43 {strides = array<i32>} : memref<1x1x8x64xf32, #tpu.memory_space<vmem>>, vector<1x1x8x64xf32>,
    return
  }
  func.func @transform_0(%arg0: i32, %arg1: i32) -> (i32, i32, i32) {
    %c0_i32 = arith.constant 0 : i32
    %c0_i32_0 = arith.constant 0 : i32
    return %arg0, %arg1, %c0_i32 : i32, i32, i32
  }
  func.func @transform_1(%arg0: i32, %arg1: i32) -> (i32, i32, i32) {
    %c0_i32 = arith.constant 0 : i32
    %c0_i32_0 = arith.constant 0 : i32
    %c0_i32_1 = arith.constant 0 : i32
    return %arg0, %c0_i32, %c0_i32_0 : i32, i32, i32
  }
  func.func @transform_2(%arg0: i32, %arg1: i32) -> (i32, i32) {
    %c0_i32 = arith.constant 0 : i32
    %c0_i32_0 = arith.constant 0 : i32
    %c0_i32_1 = arith.constant 0 : i32
    return %c0_i32, %c0_i32_0 : i32, i32
  }
  func.func @transform_3(%arg0: i32, %arg1: i32) -> (i32, i32, i32) {
    %c0_i32 = arith.constant 0 : i32
    %c0_i32_0 = arith.constant 0 : i32
    return %arg0, %arg1, %c0_i32 : i32, i32, i32
  }
  func.func @transform_4(%arg0: i32, %arg1: i32) -> (i32, i32, i32, i32) {
    %c0_i32 = arith.constant 0 : i32
    %c0_i32_0 = arith.constant 0 : i32
    %c0_i32_1 = arith.constant 0 : i32
    return %arg0, %arg1, %c0_i32, %c0_i32_0 : i32, i32, i32, i32
  }
}

module attributes {stable_mosaic.version = 11 : i64} {
  func.func @_bn_concat_kernel(%arg0: i32, %arg1: memref<32x64xbf16, #tpu.memory_space<vmem>>, %arg2: memref<32x32xbf16, #tpu.memory_space<vmem>>, %arg3: memref<1x96xf32, #tpu.memory_space<vmem>>, %arg4: memref<1x96xf32, #tpu.memory_space<vmem>>, %arg5: memref<32x96xbf16, #tpu.memory_space<vmem>>) attributes {dimension_semantics = [#tpu.dimension_semantics<parallel>], iteration_bounds = array<i64: 1>, scalar_prefetch = 0 : i64, scratch_operands = 0 : i64, tpu.core_type = #tpu.core_type<tc>, window_params = [{transform_indices = @transform_0, window_bounds = array<i64: 32, 64>}, {transform_indices = @transform_1, window_bounds = array<i64: 32, 32>}, {pipeline_mode = #tpu.pipeline_mode<synchronous>, transform_indices = @transform_2, window_bounds = array<i64: 1, 96>}, {pipeline_mode = #tpu.pipeline_mode<synchronous>, transform_indices = @transform_3, window_bounds = array<i64: 1, 96>}, {transform_indices = @transform_4, window_bounds = array<i64: 32, 96>}]} {
    %c0 = arith.constant 0 : index
    %c0_0 = arith.constant 0 : index
    %0 = vector.load %arg1[%c0, %c0_0] : memref<32x64xbf16, #tpu.memory_space<vmem>>, vector<32x64xbf16>
    %1 = arith.extf %0 : vector<32x64xbf16> to vector<32x64xf32>
    %c0_1 = arith.constant 0 : index
    %c0_2 = arith.constant 0 : index
    %2 = vector.load %arg2[%c0_1, %c0_2] : memref<32x32xbf16, #tpu.memory_space<vmem>>, vector<32x32xbf16>
    %3 = arith.extf %2 : vector<32x32xbf16> to vector<32x32xf32>
    %4 = tpu.concatenate %1, %3 in 1 : vector<32x64xf32>, vector<32x32xf32> -> vector<32x96xf32>
    %c0_3 = arith.constant 0 : index
    %c0_4 = arith.constant 0 : index
    %5 = vector.load %arg3[%c0_3, %c0_4] : memref<1x96xf32, #tpu.memory_space<vmem>>, vector<1x96xf32>
    %6 = vector.broadcast %5 : vector<1x96xf32> to vector<32x96xf32>
    %7 = arith.mulf %4, %6 : vector<32x96xf32>
    %c0_5 = arith.constant 0 : index
    %c0_6 = arith.constant 0 : index
    %8 = vector.load %arg4[%c0_5, %c0_6] : memref<1x96xf32, #tpu.memory_space<vmem>>, vector<1x96xf32>
    %9 = vector.broadcast %8 : vector<1x96xf32> to vector<32x96xf32>
    %10 = arith.addf %7, %9 : vector<32x96xf32>
    %11 = arith.truncf %10 : vector<32x96xf32> to vector<32x96xbf16>
    %c0_7 = arith.constant 0 : index
    %c0_8 = arith.constant 0 : index
    %12 = vector.load %arg5[%c0_7, %c0_8] : memref<32x96xbf16, #tpu.memory_space<vmem>>, vector<32x96xbf16>
    tpu.vector_store %arg5[%c0_7, %c0_8], %11 {strides = array<i32>} : memref<32x96xbf16, #tpu.memory_space<vmem>>, vector<32x96xbf16>,
    return
  }
  func.func @transform_0(%arg0: i32) -> (i32, i32) {
    %c0_i32 = arith.constant 0 : i32
    %c0_i32_0 = arith.constant 0 : i32
    return %arg0, %c0_i32 : i32, i32
  }
  func.func @transform_1(%arg0: i32) -> (i32, i32) {
    %c0_i32 = arith.constant 0 : i32
    %c0_i32_0 = arith.constant 0 : i32
    return %arg0, %c0_i32 : i32, i32
  }
  func.func @transform_2(%arg0: i32) -> (i32, i32) {
    %c0_i32 = arith.constant 0 : i32
    %c0_i32_0 = arith.constant 0 : i32
    %c0_i32_1 = arith.constant 0 : i32
    return %c0_i32, %c0_i32_0 : i32, i32
  }
  func.func @transform_3(%arg0: i32) -> (i32, i32) {
    %c0_i32 = arith.constant 0 : i32
    %c0_i32_0 = arith.constant 0 : i32
    %c0_i32_1 = arith.constant 0 : i32
    return %c0_i32, %c0_i32_0 : i32, i32
  }
  func.func @transform_4(%arg0: i32) -> (i32, i32) {
    %c0_i32 = arith.constant 0 : i32
    %c0_i32_0 = arith.constant 0 : i32
    return %arg0, %c0_i32 : i32, i32
  }
}

module attributes {stable_mosaic.version = 11 : i64} {
  func.func @_gemm_kernel(%arg0: i32, %arg1: i32, %arg2: memref<1x32x384xbf16, #tpu.memory_space<vmem>>, %arg3: memref<1x384x32xbf16, #tpu.memory_space<vmem>>, %arg4: memref<1x32xf32, #tpu.memory_space<vmem>>, %arg5: memref<1x32x32xbf16, #tpu.memory_space<vmem>>, %arg6: memref<1x1x8x32xf32, #tpu.memory_space<vmem>>) attributes {dimension_semantics = [#tpu.dimension_semantics<parallel>, #tpu.dimension_semantics<parallel>], iteration_bounds = array<i64: 4, 1>, scalar_prefetch = 0 : i64, scratch_operands = 0 : i64, tpu.core_type = #tpu.core_type<tc>, window_params = [{transform_indices = @transform_0, window_bounds = array<i64: 1, 32, 384>}, {transform_indices = @transform_1, window_bounds = array<i64: 1, 384, 32>}, {pipeline_mode = #tpu.pipeline_mode<synchronous>, transform_indices = @transform_2, window_bounds = array<i64: 1, 32>}, {transform_indices = @transform_3, window_bounds = array<i64: 1, 32, 32>}, {transform_indices = @transform_4, window_bounds = array<i64: 1, 1, 8, 32>}]} {
    %c0 = arith.constant 0 : index
    %c0_0 = arith.constant 0 : index
    %c0_1 = arith.constant 0 : index
    %0 = vector.load %arg2[%c0, %c0_0, %c0_1] : memref<1x32x384xbf16, #tpu.memory_space<vmem>>, vector<1x32x384xbf16>
    %1 = vector.shape_cast %0 : vector<1x32x384xbf16> to vector<32x384xbf16>
    %c0_2 = arith.constant 0 : index
    %c0_3 = arith.constant 0 : index
    %c0_4 = arith.constant 0 : index
    %2 = vector.load %arg3[%c0_2, %c0_3, %c0_4] : memref<1x384x32xbf16, #tpu.memory_space<vmem>>, vector<1x384x32xbf16>
    %3 = vector.shape_cast %2 : vector<1x384x32xbf16> to vector<384x32xbf16>
    %cst = arith.constant dense<0.000000e+00> : vector<32x32xf32>
    %4 = tpu.matmul %1, %3, %cst {dimension_numbers = #tpu.dot_dimension_numbers<[1], [0], [0], [1], [0, 0, 1, 1], [], []>} : vector<32x384xbf16>, vector<384x32xbf16>, vector<32x32xf32> -> vector<32x32xf32>
    %c0_5 = arith.constant 0 : index
    %c0_6 = arith.constant 0 : index
    %5 = vector.load %arg4[%c0_5, %c0_6] : memref<1x32xf32, #tpu.memory_space<vmem>>, vector<1x32xf32>
    %6 = vector.broadcast %5 : vector<1x32xf32> to vector<32x32xf32>
    %7 = arith.addf %4, %6 : vector<32x32xf32>
    %cst_7 = arith.constant 0.000000e+00 : f32
    %8 = vector.broadcast %cst_7 : f32 to vector<32x32xf32>
    %9 = arith.cmpf oge, %7, %8 : vector<32x32xf32>
    %cst_8 = arith.constant 0.00999999977 : f32
    %10 = vector.broadcast %cst_8 : f32 to vector<32x32xf32>
    %11 = arith.mulf %10, %7 : vector<32x32xf32>
    %12 = arith.select %9, %7, %11 : vector<32x32xi1>, vector<32x32xf32>
    %13 = arith.truncf %12 : vector<32x32xf32> to vector<32x32xbf16>
    %14 = vector.shape_cast %13 : vector<32x32xbf16> to vector<1x32x32xbf16>
    %c0_9 = arith.constant 0 : index
    %c0_10 = arith.constant 0 : index
    %c0_11 = arith.constant 0 : index
    %15 = vector.load %arg5[%c0_9, %c0_10, %c0_11] : memref<1x32x32xbf16, #tpu.memory_space<vmem>>, vector<1x32x32xbf16>
    tpu.vector_store %arg5[%c0_9, %c0_10, %c0_11], %14 {strides = array<i32>} : memref<1x32x32xbf16, #tpu.memory_space<vmem>>, vector<1x32x32xbf16>,
    %c32_i32 = arith.constant 32 : i32
    %16 = arith.muli %arg1, %c32_i32 : i32
    %17 = tpu.iota {dimensions = array<i32: 0>} : vector<32x1xi32>
    %18 = vector.broadcast %16 : i32 to vector<32x1xi32>
    %19 = arith.addi %18, %17 : vector<32x1xi32>
    %c32_i32_12 = arith.constant 32 : i32
    %20 = vector.broadcast %c32_i32_12 : i32 to vector<32x1xi32>
    %21 = arith.cmpi slt, %19, %20 : vector<32x1xi32>
    %cst_13 = arith.constant 0.000000e+00 : f32
    %22 = vector.shape_cast %21 : vector<32x1xi1> to vector<32x1xi1>
    %23 = vector.broadcast %22 : vector<32x1xi1> to vector<32x32xi1>
    %24 = vector.broadcast %cst_13 : f32 to vector<32x32xf32>
    %25 = arith.select %23, %12, %24 : vector<32x32xi1>, vector<32x32xf32>
    %cst_14 = arith.constant dense<0.000000e+00> : vector<32xf32>
    %26 = vector.multi_reduction <add>, %25, %cst_14 [0] : vector<32x32xf32> to vector<32xf32>
    %27 = vector.shape_cast %26 : vector<32xf32> to vector<1x32xf32>
    %28 = arith.mulf %25, %25 : vector<32x32xf32>
    %cst_15 = arith.constant dense<0.000000e+00> : vector<32xf32>
    %29 = vector.multi_reduction <add>, %28, %cst_15 [0] : vector<32x32xf32> to vector<32xf32>
    %30 = vector.shape_cast %29 : vector<32xf32> to vector<1x32xf32>
    %31 = tpu.iota {dimensions = array<i32: 0>} : vector<8x32xi32>
    %c0_i32 = arith.constant 0 : i32
    %32 = vector.broadcast %c0_i32 : i32 to vector<8x32xi32>
    %33 = arith.cmpi eq, %31, %32 : vector<8x32xi32>
    %34 = vector.shape_cast %27 : vector<1x32xf32> to vector<1x32xf32>
    %35 = vector.broadcast %34 : vector<1x32xf32> to vector<8x32xf32>
    %c1_i32 = arith.constant 1 : i32
    %36 = vector.broadcast %c1_i32 : i32 to vector<8x32xi32>
    %37 = arith.cmpi eq, %31, %36 : vector<8x32xi32>
    %38 = vector.shape_cast %30 : vector<1x32xf32> to vector<1x32xf32>
    %39 = vector.broadcast %38 : vector<1x32xf32> to vector<8x32xf32>
    %cst_16 = arith.constant 0.000000e+00 : f32
    %40 = vector.broadcast %cst_16 : f32 to vector<8x32xf32>
    %41 = arith.select %37, %39, %40 : vector<8x32xi1>, vector<8x32xf32>
    %42 = arith.select %33, %35, %41 : vector<8x32xi1>, vector<8x32xf32>
    %43 = vector.shape_cast %42 : vector<8x32xf32> to vector<1x1x8x32xf32>
    %c0_17 = arith.constant 0 : index
    %c0_18 = arith.constant 0 : index
    %c0_19 = arith.constant 0 : index
    %c0_20 = arith.constant 0 : index
    %44 = vector.load %arg6[%c0_17, %c0_18, %c0_19, %c0_20] : memref<1x1x8x32xf32, #tpu.memory_space<vmem>>, vector<1x1x8x32xf32>
    tpu.vector_store %arg6[%c0_17, %c0_18, %c0_19, %c0_20], %43 {strides = array<i32>} : memref<1x1x8x32xf32, #tpu.memory_space<vmem>>, vector<1x1x8x32xf32>,
    return
  }
  func.func @transform_0(%arg0: i32, %arg1: i32) -> (i32, i32, i32) {
    %c0_i32 = arith.constant 0 : i32
    %c0_i32_0 = arith.constant 0 : i32
    return %arg0, %arg1, %c0_i32 : i32, i32, i32
  }
  func.func @transform_1(%arg0: i32, %arg1: i32) -> (i32, i32, i32) {
    %c0_i32 = arith.constant 0 : i32
    %c0_i32_0 = arith.constant 0 : i32
    %c0_i32_1 = arith.constant 0 : i32
    return %arg0, %c0_i32, %c0_i32_0 : i32, i32, i32
  }
  func.func @transform_2(%arg0: i32, %arg1: i32) -> (i32, i32) {
    %c0_i32 = arith.constant 0 : i32
    %c0_i32_0 = arith.constant 0 : i32
    %c0_i32_1 = arith.constant 0 : i32
    return %c0_i32, %c0_i32_0 : i32, i32
  }
  func.func @transform_3(%arg0: i32, %arg1: i32) -> (i32, i32, i32) {
    %c0_i32 = arith.constant 0 : i32
    %c0_i32_0 = arith.constant 0 : i32
    return %arg0, %arg1, %c0_i32 : i32, i32, i32
  }
  func.func @transform_4(%arg0: i32, %arg1: i32) -> (i32, i32, i32, i32) {
    %c0_i32 = arith.constant 0 : i32
    %c0_i32_0 = arith.constant 0 : i32
    %c0_i32_1 = arith.constant 0 : i32
    return %arg0, %arg1, %c0_i32, %c0_i32_0 : i32, i32, i32, i32
  }
}

module attributes {stable_mosaic.version = 11 : i64} {
  func.func @_concat_matmul_kernel(%arg0: i32, %arg1: memref<128x32xbf16, #tpu.memory_space<vmem>>, %arg2: memref<128x16xbf16, #tpu.memory_space<vmem>>, %arg3: memref<32x1xf32, #tpu.memory_space<vmem>>, %arg4: memref<16x1xf32, #tpu.memory_space<vmem>>, %arg5: memref<1x1xf32, #tpu.memory_space<vmem>>, %arg6: memref<128x1xf32, #tpu.memory_space<vmem>>) attributes {dimension_semantics = [#tpu.dimension_semantics<parallel>], iteration_bounds = array<i64: 1>, scalar_prefetch = 0 : i64, scratch_operands = 0 : i64, tpu.core_type = #tpu.core_type<tc>, window_params = [{transform_indices = @transform_0, window_bounds = array<i64: 128, 32>}, {transform_indices = @transform_1, window_bounds = array<i64: 128, 16>}, {pipeline_mode = #tpu.pipeline_mode<synchronous>, transform_indices = @transform_2, window_bounds = array<i64: 32, 1>}, {pipeline_mode = #tpu.pipeline_mode<synchronous>, transform_indices = @transform_3, window_bounds = array<i64: 16, 1>}, {pipeline_mode = #tpu.pipeline_mode<synchronous>, transform_indices = @transform_4, window_bounds = array<i64: 1, 1>}, {transform_indices = @transform_5, window_bounds = array<i64: 128, 1>}]} {
    %c0 = arith.constant 0 : index
    %c0_0 = arith.constant 0 : index
    %0 = vector.load %arg1[%c0, %c0_0] : memref<128x32xbf16, #tpu.memory_space<vmem>>, vector<128x32xbf16>
    %1 = arith.extf %0 : vector<128x32xbf16> to vector<128x32xf32>
    %c0_1 = arith.constant 0 : index
    %c0_2 = arith.constant 0 : index
    %2 = vector.load %arg3[%c0_1, %c0_2] : memref<32x1xf32, #tpu.memory_space<vmem>>, vector<32x1xf32>
    %cst = arith.constant dense<0.000000e+00> : vector<128x1xf32>
    %3 = tpu.matmul %1, %2, %cst {dimension_numbers = #tpu.dot_dimension_numbers<[1], [0], [0], [1], [0, 0, 1, 1], [], []>} : vector<128x32xf32>, vector<32x1xf32>, vector<128x1xf32> -> vector<128x1xf32>
    %c0_3 = arith.constant 0 : index
    %c0_4 = arith.constant 0 : index
    %4 = vector.load %arg2[%c0_3, %c0_4] : memref<128x16xbf16, #tpu.memory_space<vmem>>, vector<128x16xbf16>
    %5 = arith.extf %4 : vector<128x16xbf16> to vector<128x16xf32>
    %c0_5 = arith.constant 0 : index
    %c0_6 = arith.constant 0 : index
    %6 = vector.load %arg4[%c0_5, %c0_6] : memref<16x1xf32, #tpu.memory_space<vmem>>, vector<16x1xf32>
    %cst_7 = arith.constant dense<0.000000e+00> : vector<128x1xf32>
    %7 = tpu.matmul %5, %6, %cst_7 {dimension_numbers = #tpu.dot_dimension_numbers<[1], [0], [0], [1], [0, 0, 1, 1], [], []>} : vector<128x16xf32>, vector<16x1xf32>, vector<128x1xf32> -> vector<128x1xf32>
    %8 = arith.addf %3, %7 : vector<128x1xf32>
    %c0_8 = arith.constant 0 : index
    %c0_9 = arith.constant 0 : index
    %9 = vector.load %arg5[%c0_8, %c0_9] : memref<1x1xf32, #tpu.memory_space<vmem>>, vector<1x1xf32>
    %10 = vector.broadcast %9 : vector<1x1xf32> to vector<128x1xf32>
    %11 = arith.addf %8, %10 : vector<128x1xf32>
    %c0_10 = arith.constant 0 : index
    %c0_11 = arith.constant 0 : index
    %12 = vector.load %arg6[%c0_10, %c0_11] : memref<128x1xf32, #tpu.memory_space<vmem>>, vector<128x1xf32>
    tpu.vector_store %arg6[%c0_10, %c0_11], %11 {strides = array<i32>} : memref<128x1xf32, #tpu.memory_space<vmem>>, vector<128x1xf32>,
    return
  }
  func.func @transform_0(%arg0: i32) -> (i32, i32) {
    %c0_i32 = arith.constant 0 : i32
    %c0_i32_0 = arith.constant 0 : i32
    return %arg0, %c0_i32 : i32, i32
  }
  func.func @transform_1(%arg0: i32) -> (i32, i32) {
    %c0_i32 = arith.constant 0 : i32
    %c0_i32_0 = arith.constant 0 : i32
    return %arg0, %c0_i32 : i32, i32
  }
  func.func @transform_2(%arg0: i32) -> (i32, i32) {
    %c0_i32 = arith.constant 0 : i32
    %c0_i32_0 = arith.constant 0 : i32
    %c0_i32_1 = arith.constant 0 : i32
    return %c0_i32, %c0_i32_0 : i32, i32
  }
  func.func @transform_3(%arg0: i32) -> (i32, i32) {
    %c0_i32 = arith.constant 0 : i32
    %c0_i32_0 = arith.constant 0 : i32
    %c0_i32_1 = arith.constant 0 : i32
    return %c0_i32, %c0_i32_0 : i32, i32
  }
  func.func @transform_4(%arg0: i32) -> (i32, i32) {
    %c0_i32 = arith.constant 0 : i32
    %c0_i32_0 = arith.constant 0 : i32
    %c0_i32_1 = arith.constant 0 : i32
    return %c0_i32, %c0_i32_0 : i32, i32
  }
  func.func @transform_5(%arg0: i32) -> (i32, i32) {
    %c0_i32 = arith.constant 0 : i32
    %c0_i32_0 = arith.constant 0 : i32
    return %arg0, %c0_i32 : i32, i32
  }
}

</mosaic_0001>

<bundles_post_ra>
// kernel: net2d_forward.11
= control target key start
LH: loop header
LB: loop body
LE: loop exit
PB: predicated region body
PF: predicated region fallthrough
CT: control target
= control target key end

     0   :  { %vm156_vm0 = vcmask 125952   ;;  %s400_s0 = inlined_call_operand.vmem [shape: bf16[128,16], index: 0, kind: input, shape index: {}]   ;;  %s401_s1 = inlined_call_operand.vmem [shape: f32[1,16], index: 1, kind: input, shape index: {}]   ;;  %s402_s2 = inlined_call_operand.vmem [shape: f32[1,16], index: 2, kind: input, shape index: {}]   ;;  %s403_s3 = inlined_call_operand.vmem [shape: bf16[128,16], index: 3, kind: output, shape index: {}]  }
   0x1   :  { %v212_v0 = vld [vmem:[%s400_s0] sm:$0xff]   ;;  %v243_v4 = vld [vmem:[%s400_s0 + $0x8] sm:$0xff]   ;;  %v244_v5 = vld [vmem:[%s400_s0 + $0x10] sm:$0xff]  }
   0x2   :  { %v276_v1 = vld [vmem:[%s401_s1] ss:$0 sm:$0xff]  ;;  %v213_v2 = vunpack.c.l.bf16 %v212_v0  ;;  %v214_v3 = vunpack.c.h.bf16 %v212_v0  ;;  %v245_v6 = vld [vmem:[%s400_s0 + $0x18] sm:$0xff]   ;;  %v217_v8 = vunpack.c.l.bf16 %v243_v4  ;;  %v218_v9 = vunpack.c.h.bf16 %v243_v4  ;;  %v247_v33 = vld [vmem:[%s400_s0 + $0x28] sm:$0xff]  }
   0x3   :  { %v290_v7 = vld [vmem:[%s402_s2] ss:$0 sm:$0xff]  ;;  %v221_v10 = vunpack.c.l.bf16 %v244_v5  ;;  %v222_v11 = vunpack.c.h.bf16 %v244_v5  ;;  %v225_v14 = vunpack.c.l.bf16 %v245_v6  ;;  %v226_v15 = vunpack.c.h.bf16 %v245_v6  ;;  %v248_v34 = vld [vmem:[%s400_s0 + $0x30] sm:$0xff]   ;;  %v249_v39 = vld [vmem:[%s400_s0 + $0x38] sm:$0xff]  }
   0x4   :  { %v53_v12 = vmul.f32 %v213_v2, %v276_v1  ;;  %v54_v13 = vmul.f32 %v214_v3, %v276_v1  ;;  %v55_v16 = vmul.f32 %v217_v8, %v276_v1  ;;  %v56_v17 = vmul.f32 %v218_v9, %v276_v1  ;;  %v246_v28 = vld [vmem:[%s400_s0 + $0x20] sm:$0xff]  }
   0x5   :  { %v57_v18 = vmul.f32 %v221_v10, %v276_v1  ;;  %v58_v19 = vmul.f32 %v222_v11, %v276_v1  ;;  %v59_v22 = vmul.f32 %v225_v14, %v276_v1  ;;  %v60_v23 = vmul.f32 %v226_v15, %v276_v1 }
   0x6   :  { %v76_v20 = vadd.f32 %v290_v7, %v53_v12  ;;  %v77_v21 = vadd.f32 %v290_v7, %v54_v13  ;;  %v78_v24 = vadd.f32 %v290_v7, %v55_v16  ;;  %v79_v25 = vadd.f32 %v290_v7, %v56_v17 }
   0x7   :  { %v80_v26 = vadd.f32 %v290_v7, %v57_v18  ;;  %v81_v27 = vadd.f32 %v290_v7, %v58_v19  ;;  %v82_v31 = vadd.f32 %v290_v7, %v59_v22  ;;  %v83_v32 = vadd.f32 %v290_v7, %v60_v23 }
   0x8   :  { %v195_v29 = vpack.c.bf16 %v76_v20, %v76_v20  ;;  %v196_v30 = vpack.c.bf16 %v77_v21, %v77_v21  ;;  %v197_v35 = vpack.c.bf16 %v78_v24, %v78_v24  ;;  %v198_v36 = vpack.c.bf16 %v79_v25, %v79_v25 }
   0x9   :  { %v199_v37 = vpack.c.bf16 %v80_v26, %v80_v26  ;;  %v200_v38 = vpack.c.bf16 %v81_v27, %v81_v27  ;;  %v201_v40 = vpack.c.bf16 %v82_v31, %v82_v31  ;;  %v202_v41 = vpack.c.bf16 %v83_v32, %v83_v32 }
   0xa   :  { %157 = vst.msk [vmem:[%s403_s3] sm:$0xf] %vm156_vm0, %v195_v29  ;;  %158 = vst.msk [vmem:[%s403_s3 + $0x4] sm:$0xf] %vm156_vm0, %v196_v30  ;;  %v229_v42 = vunpack.c.l.bf16 %v246_v28  ;;  %v230_v43 = vunpack.c.h.bf16 %v246_v28  ;;  %v233_v44 = vunpack.c.l.bf16 %v247_v33  ;;  %v234_v45 = vunpack.c.h.bf16 %v247_v33 }
   0xb   :  { %159 = vst.msk [vmem:[%s403_s3 + $0x8] sm:$0xf] %vm156_vm0, %v197_v35  ;;  %160 = vst.msk [vmem:[%s403_s3 + $0xc] sm:$0xf] %vm156_vm0, %v198_v36  ;;  %v237_v46 = vunpack.c.l.bf16 %v248_v34  ;;  %v238_v47 = vunpack.c.h.bf16 %v248_v34  ;;  %v241_v50 = vunpack.c.l.bf16 %v249_v39  ;;  %v242_v51 = vunpack.c.h.bf16 %v249_v39 }
   0xc   :  { %161 = vst.msk [vmem:[%s403_s3 + $0x10] sm:$0xf] %vm156_vm0, %v199_v37  ;;  %162 = vst.msk [vmem:[%s403_s3 + $0x14] sm:$0xf] %vm156_vm0, %v200_v38  ;;  %v61_v48 = vmul.f32 %v229_v42, %v276_v1  ;;  %v62_v49 = vmul.f32 %v230_v43, %v276_v1  ;;  %v63_v52 = vmul.f32 %v233_v44, %v276_v1 }
   0xd   :  { %163 = vst.msk [vmem:[%s403_s3 + $0x18] sm:$0xf] %vm156_vm0, %v201_v40  ;;  %164 = vst.msk [vmem:[%s403_s3 + $0x1c] sm:$0xf] %vm156_vm0, %v202_v41  ;;  %v64_v53 = vmul.f32 %v234_v45, %v276_v1  ;;  %v65_v54 = vmul.f32 %v237_v46, %v276_v1  ;;  %v66_v55 = vmul.f32 %v238_v47, %v276_v1 }
   0xe   :  { %v84_v56 = vadd.f32 %v290_v7, %v61_v48  ;;  %v85_v57 = vadd.f32 %v290_v7, %v62_v49  ;;  %v67_v58 = vmul.f32 %v241_v50, %v276_v1  ;;  %v68_v59 = vmul.f32 %v242_v51, %v276_v1 }
   0xf   :  { %v86_v60 = vadd.f32 %v290_v7, %v63_v52  ;;  %v87_v61 = vadd.f32 %v290_v7, %v64_v53  ;;  %v88_v62 = vadd.f32 %v290_v7, %v65_v54  ;;  %v89_v63 = vadd.f32 %v290_v7, %v66_v55 }
  0x10   :  { %v203_v0 = vpack.c.bf16 %v84_v56, %v84_v56  ;;  %v204_v2 = vpack.c.bf16 %v85_v57, %v85_v57  ;;  %v90_v3 = vadd.f32 %v290_v7, %v67_v58  ;;  %v91_v4 = vadd.f32 %v290_v7, %v68_v59 }
  0x11   :  { %v205_v5 = vpack.c.bf16 %v86_v60, %v86_v60  ;;  %v206_v6 = vpack.c.bf16 %v87_v61, %v87_v61  ;;  %v207_v8 = vpack.c.bf16 %v88_v62, %v88_v62  ;;  %v208_v9 = vpack.c.bf16 %v89_v63, %v89_v63 }
  0x12   :  { %165 = vst.msk [vmem:[%s403_s3 + $0x20] sm:$0xf] %vm156_vm0, %v203_v0  ;;  %166 = vst.msk [vmem:[%s403_s3 + $0x24] sm:$0xf] %vm156_vm0, %v204_v2  ;;  %v209_v1 = vpack.c.bf16 %v90_v3, %v90_v3  ;;  %v210_v10 = vpack.c.bf16 %v91_v4, %v91_v4 }
  0x13   :  { %167 = vst.msk [vmem:[%s403_s3 + $0x28] sm:$0xf] %vm156_vm0, %v205_v5  ;;  %168 = vst.msk [vmem:[%s403_s3 + $0x2c] sm:$0xf] %vm156_vm0, %v206_v6 }
  0x14   :  { %169 = vst.msk [vmem:[%s403_s3 + $0x30] sm:$0xf] %vm156_vm0, %v207_v8  ;;  %170 = vst.msk [vmem:[%s403_s3 + $0x34] sm:$0xf] %vm156_vm0, %v208_v9 }
  0x15   :  { %171 = vst.msk [vmem:[%s403_s3 + $0x38] sm:$0xf] %vm156_vm0, %v209_v1  ;;  %172 = vst.msk [vmem:[%s403_s3 + $0x3c] sm:$0xf] %vm156_vm0, %v210_v10 }

// kernel: net2d_forward.10
= control target key start
LH: loop header
LB: loop body
LE: loop exit
PB: predicated region body
PF: predicated region fallthrough
CT: control target
= control target key end

     0   :  { %vm100_vm0 = vcmask 293888   ;;  %vm125_vm1 = vcmask 1041408   ;;  %vm338_vm3 = vcmask 125952   ;;  %vm454_vm4 = vcmask 130048   ;;  %s875_s1 = inlined_call_operand.vmem [shape: bf16[1,36,16], index: 1, kind: input, shape index: {}]   ;;  %s876_s0 = inlined_call_operand.vmem [shape: bf16[1,128,36], index: 0, kind: input, shape index: {}]   ;;  %s877_s2 = inlined_call_operand.vmem [shape: f32[1,16], index: 2, kind: input, shape index: {}]   ;;  %s878_s3 = inlined_call_operand.vmem [shape: bf16[1,128,16], index: 3, kind: output, shape index: {0}]   ;;  %s879_s4 = inlined_call_operand.vmem [shape: f32[1,1,8,16], index: 4, kind: output, shape index: {1}]  }
   0x1   :  { %v651_v0 = vld [vmem:[%s875_s1] sm:$0xff]   ;;  %v652_v1 = vld [vmem:[%s875_s1 + $0x8] sm:$0xff]   ;;  %v653_v2 = vld [vmem:[%s875_s1 + $0x10] ss:$0 sps:$4 sm:$0x33]  }
   0x2   :  { %621 = vmatprep.subr.bf16.mxu0 %v651_v0  ;;  %643 = vmatprep.subr.bf16.mxu1 %v651_v0  ;;  %v654_v3 = vld [vmem:[%s876_s0] sm:$0xff]   ;;  %v127_v5 = vsel %vm125_vm1, %v653_v2, 0  ;;  %v655_v6 = vld [vmem:[%s876_s0 + $0x8] sm:$0xff]   ;;  %v656_v8 = vld [vmem:[%s876_s0 + $0x10] sm:$0xff]  }
   0x3   :  { %622 = vmatpush3.bf16.msra.mxu0 %v651_v0  ;;  %646 = vmatpush3.bf16.msra.mxu1 %v651_v0  ;;  %v658_v4 = vld [vmem:[%s876_s0 + $0x20] sm:$0xff]   ;;  %v659_v7 = vld [vmem:[%s876_s0 + $0x28] sm:$0xff]   ;;  %v660_v9 = vld [vmem:[%s876_s0 + $0x30] sm:$0xff]  }
   0x4   :  { %623 = vmatprep.subr.bf16.mxu0 %v652_v1  ;;  %627 = vmatprep.mubr.msk.bf16.mxu0 %vm100_vm0, %v654_v3  ;;  %v657_v10 = vld [vmem:[%s876_s0 + $0x18] sm:$0xff]   ;;  %v731_v12 = vld [vmem:[%s877_s2] ss:$0 sm:$0xff] }
   0x5   :  { %644 = vmatprep.subr.bf16.mxu1 %v652_v1  ;;  %635 = vmatprep.mubr.msk.bf16.mxu1 %vm100_vm0, %v658_v4  ;;  %v661_v11 = vld [vmem:[%s876_s0 + $0x38] sm:$0xff]  }
   0x7   :  { %624 = vmatpush3.bf16.msra.mxu0 %v652_v1  ;;  %647 = vmatpush3.bf16.msra.mxu1 %v652_v1 }
   0x8   :  { %649 = vmatprep.subr.msk.bf16.mxu0 %vm125_vm1, %v653_v2  ;;  %650 = vmatprep.subr.msk.bf16.mxu1 %vm125_vm1, %v653_v2 }
   0xb   :  { %626 = vmatpush3.bf16.msra.mxu0 %v127_v5  ;;  %648 = vmatpush3.bf16.msra.mxu1 %v127_v5 }
   0xe   :  { %628 = vmatmul.mubr.msk.bf16.vlgmr.msra.gmra.mrb[0].mxu0 %vm100_vm0, %v655_v6  ;;  %636 = vmatmul.mubr.msk.bf16.vlgmr.msra.gmra.mrb[0].mxu1 %vm100_vm0, %v659_v7 }
   0xf   :  { %631 = vmatprep.mubr.msk.bf16.mxu0 %vm100_vm0, %v656_v8  ;;  %639 = vmatprep.mubr.msk.bf16.mxu1 %vm100_vm0, %v660_v9 }
  0x16   :  { %632 = vmatmul.mubr.msk.bf16.gmra.mrb[4].mxu0 %vm100_vm0, %v657_v10  ;;  %640 = vmatmul.mubr.msk.bf16.gmra.mrb[4].mxu1 %vm100_vm0, %v661_v11 }
  0xe1   :  { %v629_v13 = vpop.f32.mrb[0].mxu0  ;;  %v637_v14 = vpop.f32.mrb[0].mxu1 }
  0xe2   :  { %v172_v15 = vadd.f32 %v629_v13, %v731_v12  ;;  %v163_v16 = vpop.f32.mrb[1].mxu0  ;;  %v195_v17 = vpop.f32.mrb[1].mxu1  ;;  %v204_v24 = vadd.f32 %v637_v14, %v731_v12 }
  0xe3   :  { %v164_v18 = vadd.f32 %v731_v12, %v163_v16  ;;  %v630_v19 = vpop.f32.mrb[2].mxu0  ;;  %v735_v20 = vpop.f32.mrb[2].mxu1  ;;  %v743_v33 = vadd.f32 %v731_v12, %v195_v17 }
  0xe4   :  { %vm228_vm2 = vcmp.ge.f32.partialorder %v172_v15, 0.0  ;;  %v244_v21 = vmul.f32 0.01, %v172_v15  ;;  %v175_v22 = vadd.f32 %v630_v19, %v731_v12  ;;  %v166_v23 = vpop.f32.mrb[3].mxu0  ;;  %v739_v25 = vpop.f32.mrb[3].mxu1  ;;  %vm236_vm7 = vcmp.ge.f32.partialorder %v204_v24, 0.0 }
  0xe5   :  { %vm226_vm5 = vcmp.ge.f32.partialorder %v164_v18, 0.0  ;;  %v242_v26 = vmul.f32 0.01, %v164_v18  ;;  %v167_v29 = vadd.f32 %v731_v12, %v166_v23  ;;  %v252_v41 = vmul.f32 0.01, %v204_v24 }
  0xe6   :  { %v260_v27 = vsel %vm228_vm2, %v172_v15, %v244_v21  ;;  %vm229_vm6 = vcmp.ge.f32.partialorder %v175_v22, 0.0  ;;  %v245_v28 = vmul.f32 0.01, %v175_v22  ;;  %vm234_vm9 = vcmp.ge.f32.partialorder %v743_v33, 0.0 }
  0xe7   :  { %v596_v30 = vpack.c.bf16 %v260_v27, %v260_v27  ;;  %v494_v31 = vmul.f32 %v260_v27, %v260_v27  ;;  %v258_v32 = vsel %vm226_vm5, %v164_v18, %v242_v26  ;;  %v458_v37 = vsel %vm454_vm4, %v260_v27, 0.0 }
  0xe8   :  { %v594_v34 = vpack.c.bf16 %v258_v32, %v258_v32  ;;  %v492_v35 = vmul.f32 %v258_v32, %v258_v32  ;;  %v261_v36 = vsel %vm229_vm6, %v175_v22, %v245_v28  ;;  %v455_v38 = vsel %vm454_vm4, %v258_v32, 0.0 }
  0xe9   :  { %341 = vst.msk [vmem:[%s878_s3 + $0x8] sm:$0xf] %vm338_vm3, %v596_v30  ;;  %v597_v39 = vpack.c.bf16 %v261_v36, %v261_v36  ;;  %v633_v40 = vpop.f32.mrb[4].mxu0  ;;  %v751_v42 = vpop.f32.mrb[4].mxu1  ;;  %v511_v43 = vsel %vm454_vm4, %v494_v31, 0.0  ;;  %vm227_vm8 = vcmp.ge.f32.partialorder %v167_v29, 0.0  ;;  %v495_v50 = vmul.f32 %v261_v36, %v261_v36 }
  0xea   :  { %339 = vst.msk [vmem:[%s878_s3] sm:$0xf] %vm338_vm3, %v594_v34  ;;  %v243_v44 = vmul.f32 0.01, %v167_v29  ;;  %v188_v45 = vadd.f32 %v633_v40, %v731_v12  ;;  %v179_v46 = vpop.f32.mrb[5].mxu0  ;;  %v759_v47 = vpop.f32.mrb[5].mxu1  ;;  %v268_v1 = vsel %vm236_vm7, %v204_v24, %v252_v41  ;;  %v207_v34 = vadd.f32 %v735_v20, %v731_v12 }
  0xeb   :  { %v508_v48 = vsel %vm454_vm4, %v492_v35, 0.0  ;;  %342 = vst.msk [vmem:[%s878_s3 + $0xc] sm:$0xf] %vm338_vm3, %v597_v39  ;;  %v460_v49 = vsel %vm454_vm4, %v261_v36, 0.0  ;;  %v180_v51 = vadd.f32 %v731_v12, %v179_v46  ;;  %v634_v52 = vpop.f32.mrb[6].mxu0  ;;  %v769_v53 = vpop.f32.mrb[6].mxu1 }
  0xec   :  { %v259_v54 = vsel %vm227_vm8, %v167_v29, %v243_v44  ;;  %vm232_vm10 = vcmp.ge.f32.partialorder %v188_v45, 0.0  ;;  %v248_v55 = vmul.f32 0.01, %v188_v45  ;;  %v191_v56 = vadd.f32 %v634_v52, %v731_v12  ;;  %v182_v57 = vpop.f32.mrb[7].mxu0  ;;  %v772_v58 = vpop.f32.mrb[7].mxu1 }
  0xed   :  { %v595_v59 = vpack.c.bf16 %v259_v54, %v259_v54  ;;  %v456_v60 = vsel %vm454_vm4, %v259_v54, 0.0  ;;  %v493_v61 = vmul.f32 %v259_v54, %v259_v54  ;;  %vm230_vm11 = vcmp.ge.f32.partialorder %v180_v51, 0.0 }
  0xee   :  { %v457_v62 = vadd.f32 %v456_v60, %v455_v38  ;;  %v264_v63 = vsel %vm232_vm10, %v188_v45, %v248_v55  ;;  %v246_v0 = vmul.f32 0.01, %v180_v51  ;;  %vm233_vm12 = vcmp.ge.f32.partialorder %v191_v56, 0.0 }
  0xef   :  { %340 = vst.msk [vmem:[%s878_s3 + $0x4] sm:$0xf] %vm338_vm3, %v595_v59  ;;  %v509_v2 = vsel %vm454_vm4, %v493_v61, 0.0  ;;  %v600_v3 = vpack.c.bf16 %v264_v63, %v264_v63  ;;  %v250_v4 = vmul.f32 0.01, %v743_v33  ;;  %v498_v9 = vmul.f32 %v264_v63, %v264_v63 }
  0xf0   :  { %v459_v5 = vadd.f32 %v458_v37, %v457_v62  ;;  %v510_v6 = vadd.f32 %v509_v2, %v508_v48  ;;  %v262_v7 = vsel %vm230_vm11, %v180_v51, %v246_v0  ;;  %v249_v8 = vmul.f32 0.01, %v191_v56 }
  0xf1   :  { %345 = vst.msk [vmem:[%s878_s3 + $0x18] sm:$0xf] %vm338_vm3, %v600_v3  ;;  %v598_v10 = vpack.c.bf16 %v262_v7, %v262_v7  ;;  %v462_v11 = vsel %vm454_vm4, %v262_v7, 0.0  ;;  %v496_v13 = vmul.f32 %v262_v7, %v262_v7  ;;  %v183_v17 = vadd.f32 %v731_v12, %v182_v57 }
  0xf2   :  { %v512_v14 = vadd.f32 %v511_v43, %v510_v6  ;;  %v461_v15 = vadd.f32 %v460_v49, %v459_v5  ;;  %v265_v16 = vsel %vm233_vm12, %v191_v56, %v249_v8  ;;  %v513_v18 = vsel %vm454_vm4, %v495_v50, 0.0 }
  0xf3   :  { %343 = vst.msk [vmem:[%s878_s3 + $0x10] sm:$0xf] %vm338_vm3, %v598_v10  ;;  %v515_v19 = vsel %vm454_vm4, %v496_v13, 0.0  ;;  %v601_v21 = vpack.c.bf16 %v265_v16, %v265_v16  ;;  %v499_v22 = vmul.f32 %v265_v16, %v265_v16  ;;  %vm231_vm13 = vcmp.ge.f32.partialorder %v183_v17, 0.0 }
  0xf4   :  { %v463_v23 = vadd.f32 %v462_v11, %v461_v15  ;;  %v514_v24 = vadd.f32 %v513_v18, %v512_v14  ;;  %v247_v26 = vmul.f32 0.01, %v183_v17  ;;  %v466_v27 = vsel %vm454_vm4, %v264_v63, 0.0 }
  0xf5   :  { %v519_v28 = vsel %vm454_vm4, %v498_v9, 0.0  ;;  %346 = vst.msk [vmem:[%s878_s3 + $0x1c] sm:$0xf] %vm338_vm3, %v601_v21  ;;  %v604_v29 = vpack.c.bf16 %v268_v1, %v268_v1  ;;  %v266_v32 = vsel %vm234_vm9, %v743_v33, %v250_v4  ;;  %v468_v35 = vsel %vm454_vm4, %v265_v16, 0.0 }
  0xf6   :  { %v516_v30 = vadd.f32 %v515_v19, %v514_v24  ;;  %v263_v31 = vsel %vm231_vm13, %v183_v17, %v247_v26  ;;  %v521_v39 = vsel %vm454_vm4, %v499_v22, 0.0  ;;  %v474_v41 = vsel %vm454_vm4, %v268_v1, 0.0 }
  0xf7   :  { %v599_v36 = vpack.c.bf16 %v263_v31, %v263_v31  ;;  %v464_v37 = vsel %vm454_vm4, %v263_v31, 0.0  ;;  %v497_v38 = vmul.f32 %v263_v31, %v263_v31  ;;  %349 = vst.msk [vmem:[%s878_s3 + $0x28] sm:$0xf] %vm338_vm3, %v604_v29  ;;  %v602_v33 = vpack.c.bf16 %v266_v32, %v266_v32 }
  0xf8   :  { %v465_v40 = vadd.f32 %v464_v37, %v463_v23  ;;  %vm237_vm14 = vcmp.ge.f32.partialorder %v207_v34, 0.0  ;;  %v253_v43 = vmul.f32 0.01, %v207_v34  ;;  %v199_v44 = vadd.f32 %v731_v12, %v739_v25 }
  0xf9   :  { %344 = vst.msk [vmem:[%s878_s3 + $0x14] sm:$0xf] %vm338_vm3, %v599_v36  ;;  %v517_v20 = vsel %vm454_vm4, %v497_v38, 0.0  ;;  %347 = vst.msk [vmem:[%s878_s3 + $0x20] sm:$0xf] %vm338_vm3, %v602_v33  ;;  %v500_v48 = vmul.f32 %v266_v32, %v266_v32  ;;  %v220_v49 = vadd.f32 %v751_v42, %v731_v12  ;;  %v502_v50 = vmul.f32 %v268_v1, %v268_v1 }
  0xfa   :  { %v467_v45 = vadd.f32 %v466_v27, %v465_v40  ;;  %v518_v46 = vadd.f32 %v517_v20, %v516_v30  ;;  %v269_v51 = vsel %vm237_vm14, %v207_v34, %v253_v43  ;;  %vm235_vm15 = vcmp.ge.f32.partialorder %v199_v44, 0.0 }
  0xfb   :  { %v251_v52 = vmul.f32 0.01, %v199_v44  ;;  %v605_v56 = vpack.c.bf16 %v269_v51, %v269_v51  ;;  %v212_v25 = vadd.f32 %v731_v12, %v759_v47  ;;  %v470_v57 = vsel %vm454_vm4, %v266_v32, 0.0 }
  0xfc   :  { %v520_v54 = vadd.f32 %v519_v28, %v518_v46  ;;  %v469_v55 = vadd.f32 %v468_v35, %v467_v45  ;;  %vm240_vm0 = vcmp.ge.f32.partialorder %v220_v49, 0.0  ;;  %v256_v60 = vmul.f32 0.01, %v220_v49 }
  0xfd   :  { %v267_v59 = vsel %vm235_vm15, %v199_v44, %v251_v52  ;;  %v523_v63 = vsel %vm454_vm4, %v500_v48, 0.0  ;;  %350 = vst.msk [vmem:[%s878_s3 + $0x2c] sm:$0xf] %vm338_vm3, %v605_v56  ;;  %v503_v0 = vmul.f32 %v269_v51, %v269_v51  ;;  %vm238_vm1 = vcmp.ge.f32.partialorder %v212_v25, 0.0 }
  0xfe   :  { %v471_v61 = vadd.f32 %v470_v57, %v469_v55  ;;  %v522_v62 = vadd.f32 %v521_v39, %v520_v54  ;;  %v603_v42 = vpack.c.bf16 %v267_v59, %v267_v59  ;;  %v472_v1 = vsel %vm454_vm4, %v267_v59, 0.0 }
  0xff   :  { %v501_v2 = vmul.f32 %v267_v59, %v267_v59  ;;  %v272_v47 = vsel %vm240_vm0, %v220_v49, %v256_v60  ;;  %v527_v6 = vsel %vm454_vm4, %v502_v50, 0.0  ;;  %v254_v8 = vmul.f32 0.01, %v212_v25 }
 0x100   :  { %v524_v3 = vadd.f32 %v523_v63, %v522_v62  ;;  %348 = vst.msk [vmem:[%s878_s3 + $0x24] sm:$0xf] %vm338_vm3, %v603_v42  ;;  %v473_v4 = vadd.f32 %v472_v1, %v471_v61  ;;  %v608_v5 = vpack.c.bf16 %v272_v47, %v272_v47  ;;  %v223_v9 = vadd.f32 %v769_v53, %v731_v12 }
 0x101   :  { %v525_v7 = vsel %vm454_vm4, %v501_v2, 0.0  ;;  %v476_v10 = vsel %vm454_vm4, %v269_v51, 0.0  ;;  %v215_v14 = vadd.f32 %v731_v12, %v772_v58  ;;  %v529_v15 = vsel %vm454_vm4, %v503_v0, 0.0 }
 0x102   :  { %v475_v11 = vadd.f32 %v474_v41, %v473_v4  ;;  %v526_v13 = vadd.f32 %v525_v7, %v524_v3  ;;  %353 = vst.msk [vmem:[%s878_s3 + $0x38] sm:$0xf] %vm338_vm3, %v608_v5  ;;  %v270_v16 = vsel %vm238_vm1, %v212_v25, %v254_v8  ;;  %vm241_vm2 = vcmp.ge.f32.partialorder %v223_v9, 0.0 }
 0x103   :  { %v257_v17 = vmul.f32 0.01, %v223_v9  ;;  %v606_v19 = vpack.c.bf16 %v270_v16, %v270_v16  ;;  %v478_v21 = vsel %vm454_vm4, %v270_v16, 0.0  ;;  %v504_v22 = vmul.f32 %v270_v16, %v270_v16 }
 0x104   :  { %v528_v18 = vadd.f32 %v527_v6, %v526_v13  ;;  %v477_v53 = vadd.f32 %v476_v10, %v475_v11  ;;  %vm239_vm5 = vcmp.ge.f32.partialorder %v215_v14, 0.0  ;;  %v255_v24 = vmul.f32 0.01, %v215_v14 }
 0x105   :  { %v273_v23 = vsel %vm241_vm2, %v223_v9, %v257_v17  ;;  %351 = vst.msk [vmem:[%s878_s3 + $0x30] sm:$0xf] %vm338_vm3, %v606_v19  ;;  %v506_v27 = vmul.f32 %v272_v47, %v272_v47  ;;  %v531_v28 = vsel %vm454_vm4, %v504_v22, 0.0  ;;  %v482_v36 = vsel %vm454_vm4, %v272_v47, 0.0 }
 0x106   :  { %v479_v12 = vadd.f32 %v478_v21, %v477_v53  ;;  %v530_v58 = vadd.f32 %v529_v15, %v528_v18  ;;  %v609_v26 = vpack.c.bf16 %v273_v23, %v273_v23  ;;  %v271_v29 = vsel %vm239_vm5, %v215_v14, %v255_v24 }
 0x107   :  { %v607_v31 = vpack.c.bf16 %v271_v29, %v271_v29  ;;  %v480_v32 = vsel %vm454_vm4, %v271_v29, 0.0  ;;  %v505_v34 = vmul.f32 %v271_v29, %v271_v29  ;;  %v507_v37 = vmul.f32 %v273_v23, %v273_v23 }
 0x108   :  { %v532_v30 = vadd.f32 %v531_v28, %v530_v58  ;;  %354 = vst.msk [vmem:[%s878_s3 + $0x3c] sm:$0xf] %vm338_vm3, %v609_v26  ;;  %v481_v35 = vadd.f32 %v480_v32, %v479_v12  ;;  %v535_v41 = vsel %vm454_vm4, %v506_v27, 0.0  ;;  %v484_v33 = vsel %vm454_vm4, %v273_v23, 0.0 }
 0x109   :  { %352 = vst.msk [vmem:[%s878_s3 + $0x34] sm:$0xf] %vm338_vm3, %v607_v31  ;;  %v533_v38 = vsel %vm454_vm4, %v505_v34, 0.0  ;;  %v537_v44 = vsel %vm454_vm4, %v507_v37, 0.0  ;;  %v356_v50 = vlaneseq }
 0x10a   :  { %v483_v39 = vadd.f32 %v482_v36, %v481_v35  ;;  %v534_v40 = vadd.f32 %v533_v38, %v532_v30 }
 0x10b   :  { %v357_v56 = vshrl.u32 %v356_v50, 7 }
 0x10c   :  { %v485_v20 = vadd.f32 %v484_v33, %v483_v39  ;;  %v536_v43 = vadd.f32 %v535_v41, %v534_v40 }
 0x10d   :  { %vm546_vm3 = vcmp.eq.s32.totalorder %v357_v56, 1  ;;  %vm545_vm6 = vcmp.eq.s32.totalorder %v357_v56, 0 }
 0x10e   :  { %v486_v45 = vrot.slane %v485_v20, 4  ;;  %v538_v46 = vadd.f32 %v537_v44, %v536_v43 }
 0x110   :  { %v487_v48 = vadd.f32 %v486_v45, %v485_v20  ;;  %v539_v49 = vrot.slane %v538_v46, 4 }
 0x112   :  { %v488_v51 = vrot.slane %v487_v48, 2  ;;  %v540_v52 = vadd.f32 %v539_v49, %v538_v46 }
 0x114   :  { %v489_v54 = vadd.f32 %v488_v51, %v487_v48  ;;  %v541_v55 = vrot.slane %v540_v52, 2 }
 0x116   :  { %v542_v25 = vadd.f32 %v541_v55, %v540_v52  ;;  %v490_v57 = vrot.slane %v489_v54, 1 }
 0x118   :  { %v543_v59 = vrot.slane %v542_v25, 1  ;;  %v491_v61 = vadd.f32 %v490_v57, %v489_v54 }
 0x11a   :  { %v544_v60 = vadd.f32 %v543_v59, %v542_v25 }
 0x11c   :  { %v547_v62 = vsel %vm546_vm3, %v544_v60, 0.0 }
 0x11d   :  { %v548_v63 = vsel %vm545_vm6, %v491_v61, %v547_v62 }
 0x11e   :  { %549 = vst.msk [vmem:[%s879_s4] sm:$0xff] %vm454_vm4, %v548_v63 }

// kernel: net2d_forward.13
= control target key start
LH: loop header
LB: loop body
LE: loop exit
PB: predicated region body
PF: predicated region fallthrough
CT: control target
= control target key end

     0   :  { %vm60_vm0 = vcmask 257024   ;;  %s132_s0 = inlined_call_operand.vmem [shape: bf16[32,32], index: 0, kind: input, shape index: {}]   ;;  %s133_s1 = inlined_call_operand.vmem [shape: f32[1,32], index: 1, kind: input, shape index: {}]   ;;  %s134_s2 = inlined_call_operand.vmem [shape: f32[1,32], index: 2, kind: input, shape index: {}]   ;;  %s135_s3 = inlined_call_operand.vmem [shape: bf16[32,32], index: 3, kind: output, shape index: {}]  }
   0x1   :  { %v80_v0 = vld [vmem:[%s132_s0] sm:$0xff]   ;;  %v87_v4 = vld [vmem:[%s132_s0 + $0x8] sm:$0xff]  }
   0x2   :  { %v69_v1 = vld [vmem:[%s133_s1] ss:$0 sm:$0xff]  ;;  %v81_v2 = vunpack.c.l.bf16 %v80_v0  ;;  %v82_v3 = vunpack.c.h.bf16 %v80_v0  ;;  %v85_v6 = vunpack.c.l.bf16 %v87_v4  ;;  %v86_v7 = vunpack.c.h.bf16 %v87_v4 }
   0x3   :  { %v70_v5 = vld [vmem:[%s134_s2] ss:$0 sm:$0xff] }
   0x4   :  { %v29_v8 = vmul.f32 %v81_v2, %v69_v1  ;;  %v30_v9 = vmul.f32 %v82_v3, %v69_v1  ;;  %v31_v10 = vmul.f32 %v85_v6, %v69_v1  ;;  %v32_v11 = vmul.f32 %v86_v7, %v69_v1 }
   0x6   :  { %v40_v12 = vadd.f32 %v70_v5, %v29_v8  ;;  %v41_v13 = vadd.f32 %v70_v5, %v30_v9  ;;  %v42_v14 = vadd.f32 %v70_v5, %v31_v10  ;;  %v43_v15 = vadd.f32 %v70_v5, %v32_v11 }
   0x8   :  { %v75_v16 = vpack.c.bf16 %v40_v12, %v40_v12  ;;  %v76_v17 = vpack.c.bf16 %v41_v13, %v41_v13  ;;  %v77_v18 = vpack.c.bf16 %v42_v14, %v42_v14  ;;  %v78_v19 = vpack.c.bf16 %v43_v15, %v43_v15 }
   0xa   :  { %61 = vst.msk [vmem:[%s135_s3] sm:$0xf] %vm60_vm0, %v75_v16  ;;  %62 = vst.msk [vmem:[%s135_s3 + $0x4] sm:$0xf] %vm60_vm0, %v76_v17 }
   0xb   :  { %63 = vst.msk [vmem:[%s135_s3 + $0x8] sm:$0xf] %vm60_vm0, %v77_v18  ;;  %64 = vst.msk [vmem:[%s135_s3 + $0xc] sm:$0xf] %vm60_vm0, %v78_v19 }

// kernel: net2d_forward.12
= control target key start
LH: loop header
LB: loop body
LE: loop exit
PB: predicated region body
PF: predicated region fallthrough
CT: control target
= control target key end

     0   :  { %v336_v0 = vmov 0   ;;  %vm118_vm0 = vcmask 130048   ;;  %vm202_vm3 = vcmask 257024   ;;  %vm234_vm4 = vcmask 261120   ;;  %s432_s1 = inlined_call_operand.vmem [shape: bf16[1,144,32], index: 1, kind: input, shape index: {}]   ;;  %s433_s0 = inlined_call_operand.vmem [shape: bf16[1,32,144], index: 0, kind: input, shape index: {}]   ;;  %s434_s2 = inlined_call_operand.vmem [shape: f32[1,32], index: 2, kind: input, shape index: {}]   ;;  %s435_s3 = inlined_call_operand.vmem [shape: bf16[1,32,32], index: 3, kind: output, shape index: {0}]   ;;  %s436_s4 = inlined_call_operand.vmem [shape: f32[1,1,8,32], index: 4, kind: output, shape index: {1}]  }
   0x1   :  { %125 = vmatprep.subr.bf16.mxu0 %v336_v0  ;;  %302 = vmatprep.subr.bf16.mxu1 %v336_v0  ;;  %v321_v1 = vld [vmem:[%s432_s1] sm:$0xff]   ;;  %v322_v2 = vld [vmem:[%s432_s1 + $0x8] sm:$0xff]   ;;  %v323_v3 = vld [vmem:[%s432_s1 + $0x10] sm:$0xff]   ;;  %v208_v60 = vlaneseq }
   0x2   :  { %126 = vmatpush1.bf16.msra.mxu0 %v321_v1  ;;  %311 = vmatpush1.bf16.msra.mxu1 %v321_v1  ;;  %v324_v4 = vld [vmem:[%s432_s1 + $0x18] sm:$0xff]   ;;  %v332_v5 = vld [vmem:[%s433_s0 + $0x4] ss:$8 sps:$4 sm:$0xff]   ;;  %v327_v9 = vld [vmem:[%s432_s1 + $0x30] sm:$0xff]  }
   0x3   :  { %127 = vmatprep.subr.bf16.mxu0 %v336_v0  ;;  %303 = vmatprep.subr.bf16.mxu1 %v336_v0  ;;  %v335_v6 = vld [vmem:[%s433_s0 + $0x14] ss:$8 sps:$4 sm:$0xff]   ;;  %v325_v7 = vld [vmem:[%s432_s1 + $0x20] sm:$0xff]   ;;  %v326_v8 = vld [vmem:[%s432_s1 + $0x28] sm:$0xff]   ;;  %v209_v1 = vshrl.u32 %v208_v60, 7 }
   0x4   :  { %292 = vmatprep.mubr.msk.bf16.mxu0 %vm118_vm0, %v332_v5  ;;  %293 = vmatprep.mubr.msk.bf16.mxu1 %vm118_vm0, %v335_v6  ;;  %v328_v10 = vld [vmem:[%s432_s1 + $0x38] sm:$0xff]   ;;  %v329_v11 = vld [vmem:[%s432_s1 + $0x40] sm:$0xff]  }
   0x5   :  { %v330_v12 = vld [vmem:[%s433_s0] ss:$8 sps:$4 sm:$0xff]   ;;  %v333_v13 = vld [vmem:[%s433_s0 + $0x10] ss:$8 sps:$4 sm:$0xff]   ;;  %vm266_vm7 = vcmp.eq.s32.totalorder %v209_v1, 1  ;;  %vm265_vm8 = vcmp.eq.s32.totalorder %v209_v1, 0 }
   0x6   :  { %128 = vmatpush1.bf16.msra.mxu0 %v322_v2  ;;  %312 = vmatpush1.bf16.msra.mxu1 %v322_v2  ;;  %v278_v14 = vld [vmem:[%s434_s2] ss:$0 sm:$0xff] }
   0x7   :  { %129 = vmatprep.subr.bf16.mxu0 %v336_v0  ;;  %304 = vmatprep.subr.bf16.mxu1 %v336_v0 }
   0xa   :  { %130 = vmatpush1.bf16.msra.mxu0 %v323_v3  ;;  %313 = vmatpush1.bf16.msra.mxu1 %v323_v3 }
   0xb   :  { %131 = vmatprep.subr.bf16.mxu0 %v336_v0  ;;  %305 = vmatprep.subr.bf16.mxu1 %v336_v0 }
   0xe   :  { %132 = vmatpush1.bf16.msra.mxu0 %v324_v4  ;;  %314 = vmatpush1.bf16.msra.mxu1 %v324_v4 }
   0xf   :  { %133 = vmatprep.subr.bf16.mxu0 %v336_v0  ;;  %306 = vmatprep.subr.bf16.mxu1 %v336_v0 }
  0x12   :  { %134 = vmatpush1.bf16.msra.mxu0 %v325_v7  ;;  %315 = vmatpush1.bf16.msra.mxu1 %v325_v7 }
  0x13   :  { %135 = vmatprep.subr.bf16.mxu0 %v336_v0  ;;  %307 = vmatprep.subr.bf16.mxu1 %v336_v0 }
  0x16   :  { %136 = vmatpush1.bf16.msra.mxu0 %v326_v8  ;;  %316 = vmatpush1.bf16.msra.mxu1 %v326_v8 }
  0x17   :  { %137 = vmatprep.subr.bf16.mxu0 %v336_v0  ;;  %308 = vmatprep.subr.bf16.mxu1 %v336_v0 }
  0x1a   :  { %138 = vmatpush1.bf16.msra.mxu0 %v327_v9  ;;  %317 = vmatpush1.bf16.msra.mxu1 %v327_v9 }
  0x1b   :  { %139 = vmatprep.subr.bf16.mxu0 %v336_v0  ;;  %309 = vmatprep.subr.bf16.mxu1 %v336_v0 }
  0x1e   :  { %140 = vmatpush1.bf16.msra.mxu0 %v328_v10  ;;  %318 = vmatpush1.bf16.msra.mxu1 %v328_v10 }
  0x1f   :  { %141 = vmatprep.subr.bf16.mxu0 %v336_v0  ;;  %310 = vmatprep.subr.bf16.mxu1 %v336_v0 }
  0x22   :  { %142 = vmatpush1.bf16.msra.mxu0 %v329_v11  ;;  %319 = vmatpush1.bf16.msra.mxu1 %v329_v11 }
  0x25   :  { %158 = vmatmul.mubr.bf16.vlgmr.msra.gmra.mrb[0].mxu0 %v330_v12  ;;  %166 = vmatmul.mubr.bf16.vlgmr.msra.gmra.mrb[0].mxu1 %v333_v13 }
  0xf8   :  { %v159_v15 = vpop.f32.mrb[0].mxu0  ;;  %v167_v16 = vpop.f32.mrb[0].mxu1 }
  0xf9   :  { %v160_v17 = vadd.f32 %v278_v14, %v159_v15  ;;  %v168_v18 = vadd.f32 %v278_v14, %v167_v16  ;;  %v161_v19 = vpop.f32.mrb[1].mxu0  ;;  %v169_v20 = vpop.f32.mrb[1].mxu1 }
  0xfa   :  { %v162_v21 = vpop.f32.mrb[2].mxu0  ;;  %v170_v22 = vpop.f32.mrb[2].mxu1 }
  0xfb   :  { %vm174_vm1 = vcmp.ge.f32.partialorder %v160_v17, 0.0  ;;  %v178_v23 = vmul.f32 0.01, %v160_v17  ;;  %vm176_vm2 = vcmp.ge.f32.partialorder %v168_v18, 0.0  ;;  %v180_v24 = vmul.f32 0.01, %v168_v18 }
  0xfc   :  { %v163_v25 = vadd.f32 %v278_v14, %v162_v21  ;;  %v171_v26 = vadd.f32 %v278_v14, %v170_v22  ;;  %v164_v27 = vpop.f32.mrb[3].mxu0  ;;  %v172_v28 = vpop.f32.mrb[3].mxu1 }
  0xfd   :  { %v182_v29 = vsel %vm174_vm1, %v160_v17, %v178_v23  ;;  %v184_v30 = vsel %vm176_vm2, %v168_v18, %v180_v24 }
  0xfe   :  { %v298_v31 = vpack.c.bf16 %v182_v29, %v182_v29  ;;  %v300_v32 = vpack.c.bf16 %v184_v30, %v184_v30  ;;  %vm175_vm5 = vcmp.ge.f32.partialorder %v163_v25, 0.0  ;;  %v179_v33 = vmul.f32 0.01, %v163_v25 }
  0xff   :  { %v248_v34 = vmul.f32 %v182_v29, %v182_v29  ;;  %vm177_vm6 = vcmp.ge.f32.partialorder %v171_v26, 0.0  ;;  %v181_v35 = vmul.f32 0.01, %v171_v26  ;;  %v235_v36 = vsel %vm234_vm4, %v182_v29, 0.0 }
 0x100   :  { %203 = vst.msk [vmem:[%s435_s3] sm:$0xf] %vm202_vm3, %v298_v31  ;;  %205 = vst.msk [vmem:[%s435_s3 + $0x8] sm:$0xf] %vm202_vm3, %v300_v32  ;;  %v250_v37 = vmul.f32 %v184_v30, %v184_v30  ;;  %v183_v38 = vsel %vm175_vm5, %v163_v25, %v179_v33  ;;  %v238_v46 = vsel %vm234_vm4, %v184_v30, 0.0 }
 0x101   :  { %v299_v39 = vpack.c.bf16 %v183_v38, %v183_v38  ;;  %v236_v40 = vsel %vm234_vm4, %v183_v38, 0.0  ;;  %v249_v41 = vmul.f32 %v183_v38, %v183_v38  ;;  %v185_v42 = vsel %vm177_vm6, %v171_v26, %v181_v35 }
 0x102   :  { %v237_v43 = vadd.f32 %v236_v40, %v235_v36  ;;  %v301_v44 = vpack.c.bf16 %v185_v42, %v185_v42  ;;  %v252_v45 = vsel %vm234_vm4, %v248_v34, 0.0  ;;  %v251_v48 = vmul.f32 %v185_v42, %v185_v42 }
 0x103   :  { %204 = vst.msk [vmem:[%s435_s3 + $0x4] sm:$0xf] %vm202_vm3, %v299_v39  ;;  %v253_v47 = vsel %vm234_vm4, %v249_v41, 0.0  ;;  %v255_v51 = vsel %vm234_vm4, %v250_v37, 0.0  ;;  %v240_v52 = vsel %vm234_vm4, %v185_v42, 0.0 }
 0x104   :  { %v254_v49 = vadd.f32 %v253_v47, %v252_v45  ;;  %206 = vst.msk [vmem:[%s435_s3 + $0xc] sm:$0xf] %vm202_vm3, %v301_v44  ;;  %v239_v50 = vadd.f32 %v238_v46, %v237_v43  ;;  %v257_v55 = vsel %vm234_vm4, %v251_v48, 0.0 }
 0x106   :  { %v241_v53 = vadd.f32 %v240_v52, %v239_v50  ;;  %v256_v54 = vadd.f32 %v255_v51, %v254_v49 }
 0x108   :  { %v242_v56 = vrot.slane %v241_v53, 4  ;;  %v258_v57 = vadd.f32 %v257_v55, %v256_v54 }
 0x10a   :  { %v243_v58 = vadd.f32 %v242_v56, %v241_v53  ;;  %v259_v59 = vrot.slane %v258_v57, 4 }
 0x10c   :  { %v244_v61 = vrot.slane %v243_v58, 2  ;;  %v260_v62 = vadd.f32 %v259_v59, %v258_v57 }
 0x10e   :  { %v245_v63 = vadd.f32 %v244_v61, %v243_v58  ;;  %v261_v0 = vrot.slane %v260_v62, 2 }
 0x110   :  { %v262_v2 = vadd.f32 %v261_v0, %v260_v62  ;;  %v246_v3 = vrot.slane %v245_v63, 1 }
 0x112   :  { %v263_v4 = vrot.slane %v262_v2, 1  ;;  %v247_v6 = vadd.f32 %v246_v3, %v245_v63 }
 0x114   :  { %v264_v5 = vadd.f32 %v263_v4, %v262_v2 }
 0x116   :  { %v267_v7 = vsel %vm266_vm7, %v264_v5, 0.0 }
 0x117   :  { %v268_v8 = vsel %vm265_vm8, %v247_v6, %v267_v7 }
 0x118   :  { %269 = vst.msk [vmem:[%s436_s4] sm:$0xff] %vm234_vm4, %v268_v8 }

// kernel: net2d_forward.15
= control target key start
LH: loop header
LB: loop body
LE: loop exit
PB: predicated region body
PF: predicated region fallthrough
CT: control target
= control target key end

     0   :  { %vm33_vm0 = vcmask 519168   ;;  %s73_s0 = inlined_call_operand.vmem [shape: bf16[8,64], index: 0, kind: input, shape index: {}]   ;;  %s74_s1 = inlined_call_operand.vmem [shape: f32[1,64], index: 1, kind: input, shape index: {}]   ;;  %s75_s2 = inlined_call_operand.vmem [shape: f32[1,64], index: 2, kind: input, shape index: {}]   ;;  %s76_s3 = inlined_call_operand.vmem [shape: bf16[8,64], index: 3, kind: output, shape index: {}]  }
   0x1   :  { %v14_v0 = vld [vmem:[%s73_s0] sm:$0xf] }
   0x2   :  { %v39_v1 = vld [vmem:[%s74_s1] ss:$0 sm:$0xff]  ;;  %v15_v2 = vunpack.c.l.bf16 %v14_v0 }
   0x3   :  { %v40_v3 = vld [vmem:[%s75_s2] ss:$0 sm:$0xff] }
   0x4   :  { %v23_v4 = vmul.f32 %v39_v1, %v15_v2 }
   0x6   :  { %v31_v5 = vadd.f32 %v40_v3, %v23_v4 }
   0x8   :  { %v32_v6 = vpack.c.bf16 %v31_v5, %v31_v5 }
   0xa   :  { %34 = vst.msk [vmem:[%s76_s3] sm:$0xf] %vm33_vm0, %v32_v6 }

// kernel: net2d_forward.14
= control target key start
LH: loop header
LB: loop body
LE: loop exit
PB: predicated region body
PF: predicated region fallthrough
CT: control target
= control target key end

     0   :  { %v387_v1 = vmov 0.0   ;;  %vm388_vm0 = vmmov 0   ;;  %vm180_vm1 = vcmask 261120   ;;  %vm279_vm3 = vcmask 523264   ;;  %s486_s1 = inlined_call_operand.vmem [shape: bf16[1,288,64], index: 1, kind: input, shape index: {}]   ;;  %s487_s0 = inlined_call_operand.vmem [shape: bf16[1,8,288], index: 0, kind: input, shape index: {}]   ;;  %s488_s2 = inlined_call_operand.vmem [shape: f32[1,64], index: 2, kind: input, shape index: {}]   ;;  %s489_s3 = inlined_call_operand.vmem [shape: bf16[1,8,64], index: 3, kind: output, shape index: {0}]   ;;  %s490_s4 = inlined_call_operand.vmem [shape: f32[1,1,8,64], index: 4, kind: output, shape index: {1}]  }
   0x1   :  { %v366_v0 = vld [vmem:[%s486_s1 + $0x40] sm:$0xff]   ;;  %356 = vmatprep.subr.bf16.mxu1 %v387_v1  ;;  %360 = vmatprep.mubr.msk.bf16.mxu1 %vm388_vm0, %v387_v1  ;;  %v368_v3 = vld [vmem:[%s486_s1 + $0x48] sm:$0xff]   ;;  %v370_v5 = vld [vmem:[%s486_s1 + $0x50] sm:$0xff]   ;;  %vm268_vm4 = vcmask 519168   ;;  %v271_v44 = vlaneseq }
   0x2   :  { %v367_v2 = vld [vmem:[%s486_s1] sm:$0xff]   ;;  %331 = vmatprep.subr.bf16.mxu0 %v366_v0  ;;  %v369_v4 = vld [vmem:[%s486_s1 + $0x8] sm:$0xff]   ;;  %v371_v6 = vld [vmem:[%s486_s1 + $0x10] sm:$0xff]  }
   0x3   :  { %332 = vmatpush3.bf16.msra.mxu0 %v367_v2  ;;  %v372_v7 = vld [vmem:[%s486_s1 + $0x58] sm:$0xff]   ;;  %v374_v9 = vld [vmem:[%s486_s1 + $0x60] sm:$0xff]   ;;  %v376_v12 = vld [vmem:[%s486_s1 + $0x68] sm:$0xff]   ;;  %v272_v49 = vshrl.u32 %v271_v44, 7 }
   0x4   :  { %333 = vmatprep.subr.bf16.mxu0 %v368_v3  ;;  %v373_v8 = vld [vmem:[%s486_s1 + $0x18] sm:$0xff]   ;;  %v380_v10 = vld [vmem:[%s486_s1 + $0x80] sm:$0xff]   ;;  %v386_v15 = vld [vmem:[%s486_s1 + $0x88] sm:$0xff]  }
   0x5   :  { %v375_v11 = vld [vmem:[%s486_s1 + $0x20] sm:$0xff]   ;;  %357 = vmatpush3.bf16.msra.mxu1 %v380_v10  ;;  %v377_v16 = vld [vmem:[%s486_s1 + $0x28] sm:$0xff]   ;;  %v378_v17 = vld [vmem:[%s486_s1 + $0x70] sm:$0xff]   ;;  %vm296_vm5 = vcmp.eq.s32.totalorder %v272_v49, 1  ;;  %vm295_vm6 = vcmp.eq.s32.totalorder %v272_v49, 0 }
   0x6   :  { %358 = vmatprep.subr.bf16.mxu1 %v387_v1  ;;  %v17_v13 = vld [vmem:[%s487_s0] sm:$0xff]  ;;  %v385_v18 = vld [vmem:[%s487_s0 + $0x8] ss:$0 sps:$4 sm:$0xff]   ;;  %v379_v19 = vld [vmem:[%s486_s1 + $0x30] sm:$0xff]  }
   0x7   :  { %334 = vmatpush3.bf16.msra.mxu0 %v369_v4  ;;  %v310_v14 = vcombine.high %v17_v13, %v17_v13  ;;  %v381_v20 = vld [vmem:[%s486_s1 + $0x78] sm:$0xff]   ;;  %v309_v22 = vcombine.low %v17_v13, %v17_v13  ;;  %v308_v29 = vld [vmem:[%s488_s2] ss:$0 sm:$0xff] }
   0x8   :  { %335 = vmatprep.subr.bf16.mxu0 %v370_v5  ;;  %v382_v21 = vld [vmem:[%s486_s1 + $0x38] sm:$0xff]  }
   0x9   :  { %216 = vmatprep.mubr.bf16.mxu0 %v310_v14  ;;  %359 = vmatpush3.bf16.msra.mxu1 %v386_v15 }
   0xb   :  { %336 = vmatpush3.bf16.msra.mxu0 %v371_v6 }
   0xc   :  { %337 = vmatprep.subr.bf16.mxu0 %v372_v7  ;;  %361 = vmatmul.mubr.msk.bf16.vlgmr.msra.gmra.mrb[0].mxu1 %vm180_vm1, %v385_v18 }
   0xf   :  { %338 = vmatpush3.bf16.msra.mxu0 %v373_v8 }
  0x10   :  { %339 = vmatprep.subr.bf16.mxu0 %v374_v9 }
  0x13   :  { %340 = vmatpush3.bf16.msra.mxu0 %v375_v11 }
  0x14   :  { %341 = vmatprep.subr.bf16.mxu0 %v376_v12 }
  0x17   :  { %342 = vmatpush3.bf16.msra.mxu0 %v377_v16 }
  0x18   :  { %343 = vmatprep.subr.bf16.mxu0 %v378_v17 }
  0x1b   :  { %344 = vmatpush3.bf16.msra.mxu0 %v379_v19 }
  0x1c   :  { %345 = vmatprep.subr.bf16.mxu0 %v381_v20 }
  0x1f   :  { %346 = vmatpush3.bf16.msra.mxu0 %v382_v21 }
  0x22   :  { %217 = vmatmul.mubr.bf16.vlgmr.msra.gmra.mrb[0].mxu0 %v309_v22 }
  0xdf   :  { %v258_v23 = vpop.f32.mrb[0].mxu1 }
  0xe0   :  { %v362_v24 = vpop.f32.mrb[1].mxu1 }
  0xe1   :  { %v261_v25 = vpop.f32.mrb[2].mxu1 }
  0xe2   :  { %v363_v26 = vpop.f32.mrb[3].mxu1 }
  0xf5   :  { %v347_v27 = vpop.f32.mrb[0].mxu0 }
  0xf6   :  { %v348_v28 = vpop.f32.mrb[1].mxu0 }
  0xf7   :  { %v349_v30 = vadd.f32 %v348_v28, %v347_v27  ;;  %v350_v31 = vpop.f32.mrb[2].mxu0 }
  0xf8   :  { %v351_v32 = vpop.f32.mrb[3].mxu0 }
  0xf9   :  { %v219_v33 = vadd.f32 %v349_v30, %v308_v29 }
  0xfb   :  { %v259_v34 = vadd.f32 %v258_v23, %v219_v33 }
  0xfd   :  { %vm264_vm2 = vcmp.ge.f32.partialorder %v259_v34, 0.0  ;;  %v265_v35 = vmul.f32 0.01, %v259_v34 }
  0xff   :  { %v266_v36 = vsel %vm264_vm2, %v259_v34, %v265_v35 }
 0x100   :  { %v267_v37 = vpack.c.bf16 %v266_v36, %v266_v36  ;;  %v280_v38 = vsel %vm279_vm3, %v266_v36, 0.0  ;;  %v287_v39 = vmul.f32 %v266_v36, %v266_v36 }
 0x101   :  { %v281_v40 = vrot.slane %v280_v38, 4 }
 0x102   :  { %269 = vst.msk [vmem:[%s489_s3] sm:$0xf] %vm268_vm4, %v267_v37  ;;  %v288_v41 = vsel %vm279_vm3, %v287_v39, 0.0 }
 0x103   :  { %v282_v42 = vadd.f32 %v281_v40, %v280_v38  ;;  %v289_v43 = vrot.slane %v288_v41, 4 }
 0x105   :  { %v283_v45 = vrot.slane %v282_v42, 2  ;;  %v290_v46 = vadd.f32 %v289_v43, %v288_v41 }
 0x107   :  { %v284_v47 = vadd.f32 %v283_v45, %v282_v42  ;;  %v291_v48 = vrot.slane %v290_v46, 2 }
 0x109   :  { %v292_v50 = vadd.f32 %v291_v48, %v290_v46  ;;  %v285_v51 = vrot.slane %v284_v47, 1 }
 0x10b   :  { %v293_v52 = vrot.slane %v292_v50, 1  ;;  %v286_v54 = vadd.f32 %v285_v51, %v284_v47 }
 0x10d   :  { %v294_v53 = vadd.f32 %v293_v52, %v292_v50 }
 0x10f   :  { %v297_v55 = vsel %vm296_vm5, %v294_v53, 0.0 }
 0x110   :  { %v298_v56 = vsel %vm295_vm6, %v286_v54, %v297_v55 }
 0x111   :  { %299 = vst.msk [vmem:[%s490_s4] sm:$0xff] %vm279_vm3, %v298_v56 }

// kernel: net2d_forward.16
= control target key start
LH: loop header
LB: loop body
LE: loop exit
PB: predicated region body
PF: predicated region fallthrough
CT: control target
= control target key end

     0   :  { %s769_s15 = smov 0   ;;  %s771_s16 = smov 0   ;;  %s841_s0 = inlined_call_operand.vmem [shape: bf16[4,8,256], index: 0, kind: input, shape index: {}]   ;;  %s842_s1 = inlined_call_operand.vmem [shape: bf16[4,256,64], index: 1, kind: input, shape index: {}]   ;;  %s843_s2 = inlined_call_operand.vmem [shape: f32[1,64], index: 2, kind: input, shape index: {}]   ;;  %s844_s3 = inlined_call_operand.vmem [shape: bf16[4,8,64], index: 3, kind: output, shape index: {0}]   ;;  %s845_s4 = inlined_call_operand.vmem [shape: f32[4,1,8,64], index: 4, kind: output, shape index: {1}]  }
   0x1   :  { %s773_s17 = smov 0  }
   0x2 LB: > { %s27_s18 = sadd.s32 1, %s738_s16  ;;  %p626_p0 = scmp.ge.s32.totalorder %s742_s17, 1  ;;  %s742_s17 = sphi %s773_s17, %s15_s17   ;;  %s738_s16 = sphi %s771_s16, %s847_s16   ;;  %s734_s15 = sphi %s769_s15, %s846_s15  }
   0x3   : > { %p29_p1 = scmp.ge.s32.totalorder %s27_s18, 4  ;;  %p197_p2 = scmp.lt.s32.totalorder %s742_s17, 5 }
   0x5   : > { %s849_s18 = smov (%p29_p1, %s27_s18), 0  ;;  %p198_p3 = pnand %p626_p0, %p197_p2 }
   0x6   : > { %p241_p4 = scmp.lt.s32.totalorder (!%p198_p3), %s734_s15, 3  ;;  %v633_v20 = vld [vmem:[%s843_s2] ss:$0 sm:$0xff] (!%p198_p3)  ;;  %vm468_vm1 = vcmask (!%p198_p3), 523264   ;;  %vm457_vm2 = vcmask (!%p198_p3), 519168   ;;  %v460_v35 = vlaneseq (!%p198_p3) }
   0x7   : > { %201 = sbr.rel (%p198_p3) target bundleno = 288 (0x120), region = 32 }
   0x8   : > { %v461_v40 = vshrl.u32 (!%p198_p3), %v460_v35, 7 }
   0xa   : > { %vm485_vm3 = vcmp.eq.s32.totalorder (!%p198_p3), %v461_v40, 1  ;;  %vm484_vm4 = vcmp.eq.s32.totalorder (!%p198_p3), %v461_v40, 0 }
   0xe   : > { %s851_s15 = smov (!%p241_p4, %s734_s15), 3 }
   0xf   : > { %s655_s19 = sshll.u32 %s851_s15, 7  ;;  %s654_s23 = sshll.u32 %s851_s15, 3 }
  0x10   : > { %s793_s22 = scalar_lea.vmem %s842_s1, %s655_s19  ;;  %s249_s26 = scalar_lea.vmem %s841_s0, %s654_s23 }
  0x11   : > { %v702_v0 = vld [vmem:[%s793_s22 + $0x40] sm:$0xff]   ;;  %v704_v2 = vld [vmem:[%s793_s22 + $0x48] sm:$0xff]   ;;  %v706_v4 = vld [vmem:[%s793_s22 + $0x50] sm:$0xff]   ;;  %s631_s29 = sshll.u32 %s851_s15, 2  ;;  %s268_s9 = scalar_lea.vmem %s845_s4, %s654_s23 }
  0x12   : > { %v703_v1 = vld [vmem:[%s793_s22] sm:$0xff]   ;;  %656 = vmatprep.subr.bf16.mxu0 %v702_v0  ;;  %v705_v3 = vld [vmem:[%s793_s22 + $0x8] sm:$0xff]   ;;  %v707_v5 = vld [vmem:[%s793_s22 + $0x10] sm:$0xff]   ;;  %s261_s6 = scalar_lea.vmem %s844_s3, %s631_s29 }
  0x13   : > { %657 = vmatpush3.bf16.msra.mxu0 %v703_v1  ;;  %v708_v6 = vld [vmem:[%s793_s22 + $0x58] sm:$0xff]   ;;  %v710_v8 = vld [vmem:[%s793_s22 + $0x60] sm:$0xff]   ;;  %v712_v10 = vld [vmem:[%s793_s22 + $0x68] sm:$0xff]  }
  0x14   : > { %658 = vmatprep.subr.bf16.mxu0 %v704_v2  ;;  %v709_v7 = vld [vmem:[%s793_s22 + $0x18] sm:$0xff]   ;;  %v711_v9 = vld [vmem:[%s793_s22 + $0x20] sm:$0xff]   ;;  %v713_v13 = vld [vmem:[%s793_s22 + $0x28] sm:$0xff]  }
  0x15   : > { %v270_v11 = vld [vmem:[%s249_s26] sm:$0xff]  ;;  %v714_v14 = vld [vmem:[%s793_s22 + $0x70] sm:$0xff]   ;;  %v716_v16 = vld [vmem:[%s793_s22 + $0x78] sm:$0xff]  }
  0x16   : > { %v635_v12 = vcombine.high %v270_v11, %v270_v11  ;;  %v715_v15 = vld [vmem:[%s793_s22 + $0x30] sm:$0xff]   ;;  %v717_v17 = vld [vmem:[%s793_s22 + $0x38] sm:$0xff]   ;;  %v634_v18 = vcombine.low %v270_v11, %v270_v11 }
  0x17   : > { %659 = vmatpush3.bf16.msra.mxu0 %v705_v3 }
  0x18   : > { %660 = vmatprep.subr.bf16.mxu0 %v706_v4  ;;  %445 = vmatprep.mubr.bf16.mxu0 %v635_v12 }
  0x1b   : > { %661 = vmatpush3.bf16.msra.mxu0 %v707_v5 }
  0x1c   : > { %662 = vmatprep.subr.bf16.mxu0 %v708_v6 }
  0x1f   : > { %663 = vmatpush3.bf16.msra.mxu0 %v709_v7 }
  0x20   : > { %664 = vmatprep.subr.bf16.mxu0 %v710_v8 }
  0x23   : > { %665 = vmatpush3.bf16.msra.mxu0 %v711_v9 }
  0x24   : > { %666 = vmatprep.subr.bf16.mxu0 %v712_v10 }
  0x27   : > { %667 = vmatpush3.bf16.msra.mxu0 %v713_v13 }
  0x28   : > { %668 = vmatprep.subr.bf16.mxu0 %v714_v14 }
  0x2b   : > { %669 = vmatpush3.bf16.msra.mxu0 %v715_v15 }
  0x2c   : > { %670 = vmatprep.subr.bf16.mxu0 %v716_v16 }
  0x2f   : > { %671 = vmatpush3.bf16.msra.mxu0 %v717_v17 }
  0x32   : > { %446 = vmatmul.mubr.bf16.vlgmr.msra.gmra.mrb[0].mxu0 %v634_v18 }
 0x105   : > { %v672_v19 = vpop.f32.mrb[0].mxu0 }
 0x106   : > { %v673_v21 = vpop.f32.mrb[1].mxu0 }
 0x107   : > { %v674_v22 = vadd.f32 %v673_v21, %v672_v19  ;;  %v675_v23 = vpop.f32.mrb[2].mxu0 }
 0x108   : > { %v676_v24 = vpop.f32.mrb[3].mxu0 }
 0x109   : > { %v448_v25 = vadd.f32 %v674_v22, %v633_v20 }
 0x10b   : > { %vm453_vm0 = vcmp.ge.f32.partialorder %v448_v25, 0.0  ;;  %v454_v26 = vmul.f32 0.01, %v448_v25 }
 0x10d   : > { %v455_v27 = vsel %vm453_vm0, %v448_v25, %v454_v26 }
 0x10e   : > { %v456_v28 = vpack.c.bf16 %v455_v27, %v455_v27  ;;  %v469_v29 = vsel %vm468_vm1, %v455_v27, 0.0  ;;  %v476_v30 = vmul.f32 %v455_v27, %v455_v27 }
 0x10f   : > { %v470_v31 = vrot.slane %v469_v29, 4 }
 0x110   : > { %458 = vst.msk [vmem:[%s261_s6] sm:$0xf] %vm457_vm2, %v456_v28  ;;  %v477_v32 = vsel %vm468_vm1, %v476_v30, 0.0 }
 0x111   : > { %v471_v33 = vadd.f32 %v470_v31, %v469_v29  ;;  %v478_v34 = vrot.slane %v477_v32, 4 }
 0x113   : > { %v472_v36 = vrot.slane %v471_v33, 2  ;;  %v479_v37 = vadd.f32 %v478_v34, %v477_v32 }
 0x115   : > { %v473_v38 = vadd.f32 %v472_v36, %v471_v33  ;;  %v480_v39 = vrot.slane %v479_v37, 2 }
 0x117   : > { %v481_v41 = vadd.f32 %v480_v39, %v479_v37  ;;  %v474_v42 = vrot.slane %v473_v38, 1 }
 0x119   : > { %v482_v43 = vrot.slane %v481_v41, 1  ;;  %v475_v45 = vadd.f32 %v474_v42, %v473_v38 }
 0x11b   : > { %v483_v44 = vadd.f32 %v482_v43, %v481_v41 }
 0x11d   : > { %v486_v46 = vsel %vm485_vm3, %v483_v44, 0.0 }
 0x11e   : > { %v487_v47 = vsel %vm484_vm4, %v475_v45, %v486_v46 }
 0x11f   : > { %488 = vst.msk [vmem:[%s268_s9] sm:$0xff] %vm468_vm1, %v487_v47 }
 0x120 PF: > { %s15_s17 = sadd.s32 1, %s742_s17   ;;  %s846_s15 = smov %s738_s16 }
 0x121   : > { %p12_p5 = scmp.ge.s32.totalorder %s15_s17, 6   ;;  %s847_s16 = smov %s849_s18 }
 0x123   :  { %14 = sbr.rel (!%p12_p5) target bundleno = 2 (0x2), region = 77 }

// kernel: net2d_forward.17
= control target key start
LH: loop header
LB: loop body
LE: loop exit
PB: predicated region body
PF: predicated region fallthrough
CT: control target
= control target key end

     0   :  { %s140_s19 = smov 64   ;;  %vm49_vm0 = vcmask 523264   ;;  %vm92_vm1 = vcmask 781312   ;;  %s200_s1 = inlined_call_operand.vmem [shape: bf16[32,32], index: 1, kind: input, shape index: {}]   ;;  %s201_s0 = inlined_call_operand.vmem [shape: bf16[32,64], index: 0, kind: input, shape index: {}]   ;;  %s202_s2 = inlined_call_operand.vmem [shape: f32[1,96], index: 2, kind: input, shape index: {}]   ;;  %s203_s3 = inlined_call_operand.vmem [shape: f32[1,96], index: 3, kind: input, shape index: {}]   ;;  %s204_s4 = inlined_call_operand.vmem [shape: bf16[32,96], index: 4, kind: output, shape index: {}]  }
   0x1   :  { %v120_v0 = vld [vmem:[%s200_s1] sm:$0xff]   ;;  %v128_v1 = vld [vmem:[%s200_s1 + $0x8] sm:$0xff]  }
   0x2   :  { %v121_v2 = vunpack.c.l.bf16 %v120_v0  ;;  %v122_v3 = vunpack.c.h.bf16 %v120_v0  ;;  %v125_v4 = vunpack.c.l.bf16 %v128_v1  ;;  %v126_v5 = vunpack.c.h.bf16 %v128_v1  ;;  %v112_v8 = vld [vmem:[%s201_s0] sm:$0xff]   ;;  %v127_v12 = vld [vmem:[%s201_s0 + $0x8] sm:$0xff]  }
   0x3   :  { %v113_v9 = vunpack.c.l.bf16 %v112_v8  ;;  %v114_v10 = vunpack.c.h.bf16 %v112_v8  ;;  %v101_v13 = vld [vmem:[%s202_s2] ss:$0 sm:$0xff]  ;;  %v117_v19 = vunpack.c.l.bf16 %v127_v12  ;;  %v118_v20 = vunpack.c.h.bf16 %v127_v12 }
   0x4   :  { %v130_v6 = vpack.i.bf16 %v122_v3, %v121_v2  ;;  %v135_v7 = vpack.i.bf16 %v126_v5, %v125_v4  ;;  %v102_v16 = vld [vmem:[%s203_s3] ss:$0 sm:$0xff] }
   0x6   :  { %131 = vrot.lane.b32.xlu0 %v130_v6, %s140_s19 }
   0xa   :  { %136 = vrot.lane.b32.xlu0 %v135_v7, %s140_s19 }
  0x78   :  { %v132_v11 = vpop.permute.xlu0 %131 }
  0x79   :  { %v134_v14 = vunpack.i.h.bf16 %v132_v11  ;;  %v133_v15 = vunpack.i.l.bf16 %v132_v11 }
  0x7b   :  { %v50_v17 = vsel %vm49_vm0, %v113_v9, %v133_v15  ;;  %v51_v18 = vsel %vm49_vm0, %v114_v10, %v134_v14 }
  0x7c   :  { %v61_v21 = vmul.f32 %v101_v13, %v50_v17  ;;  %v62_v22 = vmul.f32 %v101_v13, %v51_v18  ;;  %v137_v23 = vpop.permute.xlu0 %136 }
  0x7d   :  { %v139_v24 = vunpack.i.h.bf16 %v137_v23  ;;  %v138_v25 = vunpack.i.l.bf16 %v137_v23 }
  0x7e   :  { %v72_v26 = vadd.f32 %v102_v16, %v61_v21  ;;  %v73_v27 = vadd.f32 %v102_v16, %v62_v22 }
  0x7f   :  { %v52_v28 = vsel %vm49_vm0, %v117_v19, %v138_v25  ;;  %v53_v29 = vsel %vm49_vm0, %v118_v20, %v139_v24 }
  0x80   :  { %v107_v30 = vpack.c.bf16 %v72_v26, %v72_v26  ;;  %v108_v31 = vpack.c.bf16 %v73_v27, %v73_v27  ;;  %v63_v32 = vmul.f32 %v101_v13, %v52_v28  ;;  %v64_v33 = vmul.f32 %v101_v13, %v53_v29 }
  0x82   :  { %93 = vst.msk [vmem:[%s204_s4] sm:$0xf] %vm92_vm1, %v107_v30  ;;  %94 = vst.msk [vmem:[%s204_s4 + $0x4] sm:$0xf] %vm92_vm1, %v108_v31  ;;  %v74_v34 = vadd.f32 %v102_v16, %v63_v32  ;;  %v75_v35 = vadd.f32 %v102_v16, %v64_v33 }
  0x84   :  { %v109_v36 = vpack.c.bf16 %v74_v34, %v74_v34  ;;  %v110_v37 = vpack.c.bf16 %v75_v35, %v75_v35 }
  0x86   :  { %95 = vst.msk [vmem:[%s204_s4 + $0x8] sm:$0xf] %vm92_vm1, %v109_v36  ;;  %96 = vst.msk [vmem:[%s204_s4 + $0xc] sm:$0xf] %vm92_vm1, %v110_v37 }

// kernel: net2d_forward.18
= control target key start
LH: loop header
LB: loop body
LE: loop exit
PB: predicated region body
PF: predicated region fallthrough
CT: control target
= control target key end

     0   :  { %s1073_s15 = smov 0   ;;  %s1075_s16 = smov 0   ;;  %s1166_s0 = inlined_call_operand.vmem [shape: bf16[4,32,384], index: 0, kind: input, shape index: {}]   ;;  %s1167_s1 = inlined_call_operand.vmem [shape: bf16[4,384,32], index: 1, kind: input, shape index: {}]   ;;  %s1168_s2 = inlined_call_operand.vmem [shape: f32[1,32], index: 2, kind: input, shape index: {}]   ;;  %s1169_s3 = inlined_call_operand.vmem [shape: bf16[4,32,32], index: 3, kind: output, shape index: {0}]   ;;  %s1170_s4 = inlined_call_operand.vmem [shape: f32[4,1,8,32], index: 4, kind: output, shape index: {1}]  }
   0x1   :  { %s1077_s17 = smov 0  }
   0x2 LB: > { %s27_s18 = sadd.s32 1, %s1042_s16  ;;  %p860_p0 = scmp.ge.s32.totalorder %s1046_s17, 1  ;;  %s1046_s17 = sphi %s1077_s17, %s15_s17   ;;  %s1042_s16 = sphi %s1075_s16, %s1172_s16   ;;  %s1038_s15 = sphi %s1073_s15, %s1171_s15  }
   0x3   : > { %p29_p1 = scmp.ge.s32.totalorder %s27_s18, 4  ;;  %p199_p2 = scmp.lt.s32.totalorder %s1046_s17, 5 }
   0x5   : > { %s1174_s18 = smov (%p29_p1, %s27_s18), 0  ;;  %p200_p3 = pnand %p860_p0, %p199_p2 }
   0x6   : > { %p247_p4 = scmp.lt.s32.totalorder (!%p200_p3), %s1038_s15, 3  ;;  %v866_v32 = vld [vmem:[%s1168_s2] ss:$0 sm:$0xff] (!%p200_p3)  ;;  %vm645_vm1 = vcmask (!%p200_p3), 257024   ;;  %vm677_vm2 = vcmask (!%p200_p3), 261120  }
   0x7   : > { %203 = sbr.rel (%p200_p3) target bundleno = 303 (0x12f), region = 32 }
   0xe   : > { %s1176_s15 = smov (!%p247_p4, %s1038_s15), 3 }
   0xf   : > { %s967_s19 = smul.u32 192, %s1176_s15  ;;  %s903_s29 = sshll.u32 %s1176_s15, 4 }
  0x10   : > { %s966_s23 = smul.u32 48, %s1176_s15  ;;  %s1134_s6 = scalar_lea.vmem %s1169_s3, %s903_s29 }
  0x11   : > { %s1097_s22 = scalar_lea.vmem %s1167_s1, %s967_s19  ;;  %s865_s7 = sshll.u32 %s1176_s15, 3 }
  0x12   : > { %v992_v0 = vld [vmem:[%s1097_s22 + $0x40] sm:$0xff]   ;;  %v994_v2 = vld [vmem:[%s1097_s22 + $0x48] sm:$0xff]   ;;  %v997_v5 = vld [vmem:[%s1097_s22 + $0x50] sm:$0xff]   ;;  %s255_s26 = scalar_lea.vmem %s1166_s0, %s966_s23  ;;  %s278_s10 = scalar_lea.vmem %s1170_s4, %s865_s7 }
  0x13   : > { %v993_v1 = vld [vmem:[%s1097_s22] sm:$0xff]   ;;  %908 = vmatprep.subr.bf16.mxu0 %v992_v0  ;;  %v996_v4 = vld [vmem:[%s1097_s22 + $0x8] sm:$0xff]   ;;  %v999_v7 = vld [vmem:[%s1097_s22 + $0x10] sm:$0xff]  }
  0x14   : > { %909 = vmatpush3.bf16.msra.mxu0 %v993_v1  ;;  %v995_v3 = vld [vmem:[%s1097_s22 + $0x80] sm:$0xff]   ;;  %v998_v6 = vld [vmem:[%s1097_s22 + $0x88] sm:$0xff]   ;;  %v1000_v8 = vld [vmem:[%s1097_s22 + $0x58] sm:$0xff]  }
  0x15   : > { %910 = vmatprep.subr.bf16.mxu0 %v994_v2  ;;  %946 = vmatprep.subr.bf16.mxu1 %v995_v3  ;;  %v1001_v9 = vld [vmem:[%s1097_s22 + $0x90] sm:$0xff]   ;;  %v1002_v10 = vld [vmem:[%s1097_s22 + $0x18] sm:$0xff]   ;;  %v1003_v11 = vld [vmem:[%s1097_s22 + $0x60] sm:$0xff]  }
  0x16   : > { %947 = vmatpush3.bf16.msra.mxu1 %v995_v3  ;;  %v1004_v12 = vld [vmem:[%s1097_s22 + $0x98] sm:$0xff]   ;;  %v1005_v13 = vld [vmem:[%s1097_s22 + $0x20] sm:$0xff]   ;;  %v1006_v15 = vld [vmem:[%s1097_s22 + $0x68] sm:$0xff]  }
  0x17   : > { %948 = vmatprep.subr.bf16.mxu1 %v998_v6  ;;  %v1007_v14 = vld [vmem:[%s1097_s22 + $0xa0] sm:$0xff]   ;;  %v1008_v16 = vld [vmem:[%s1097_s22 + $0x28] sm:$0xff]   ;;  %v1009_v18 = vld [vmem:[%s1097_s22 + $0x70] sm:$0xff]  }
  0x18   : > { %911 = vmatpush3.bf16.msra.mxu0 %v996_v4  ;;  %v1010_v17 = vld [vmem:[%s1097_s22 + $0xa8] sm:$0xff]   ;;  %v1011_v19 = vld [vmem:[%s1097_s22 + $0x30] sm:$0xff]   ;;  %v1012_v20 = vld [vmem:[%s1097_s22 + $0x78] sm:$0xff]  }
  0x19   : > { %912 = vmatprep.subr.bf16.mxu0 %v997_v5  ;;  %v1013_v21 = vld [vmem:[%s1097_s22 + $0xb0] sm:$0xff]   ;;  %v1014_v23 = vld [vmem:[%s1097_s22 + $0x38] sm:$0xff]   ;;  %v1015_v26 = vld [vmem:[%s255_s26] ss:$12 sps:$4 sm:$0xff]  }
  0x1a   : > { %949 = vmatpush3.bf16.msra.mxu1 %v998_v6  ;;  %v1017_v22 = vld [vmem:[%s255_s26 + $0x4] ss:$12 sps:$4 sm:$0xff]   ;;  %v1019_v24 = vld [vmem:[%s255_s26 + $0x8] ss:$12 sps:$4 sm:$0xff]   ;;  %v1018_v25 = vld [vmem:[%s1097_s22 + $0xb8] sm:$0xff]  }
  0x1b   : > { %950 = vmatprep.subr.bf16.mxu1 %v1001_v9  ;;  %551 = vmatprep.mubr.bf16.mxu0 %v1017_v22  ;;  %v1021_v27 = vld [vmem:[%s255_s26 + $0x1c] ss:$12 sps:$4 sm:$0xff]   ;;  %v1020_v28 = vld [vmem:[%s255_s26 + $0x20] ss:$12 sps:$4 sm:$0xff]   ;;  %v1023_v29 = vld [vmem:[%s255_s26 + $0x18] ss:$12 sps:$4 sm:$0xff]  }
  0x1c   : > { %913 = vmatpush3.bf16.msra.mxu0 %v999_v7  ;;  %962 = vmatprep.mubr.bf16.mxu1 %v1019_v24  ;;  %v651_v24 = vlaneseq }
  0x1d   : > { %914 = vmatprep.subr.bf16.mxu0 %v1000_v8 }
  0x1e   : > { %951 = vmatpush3.bf16.msra.mxu1 %v1001_v9 }
  0x1f   : > { %952 = vmatprep.subr.bf16.mxu1 %v1004_v12 }
  0x20   : > { %915 = vmatpush3.bf16.msra.mxu0 %v1002_v10 }
  0x21   : > { %916 = vmatprep.subr.bf16.mxu0 %v1003_v11 }
  0x22   : > { %953 = vmatpush3.bf16.msra.mxu1 %v1004_v12 }
  0x23   : > { %954 = vmatprep.subr.bf16.mxu1 %v1007_v14 }
  0x24   : > { %917 = vmatpush3.bf16.msra.mxu0 %v1005_v13 }
  0x25   : > { %918 = vmatprep.subr.bf16.mxu0 %v1006_v15 }
  0x26   : > { %955 = vmatpush3.bf16.msra.mxu1 %v1007_v14 }
  0x27   : > { %956 = vmatprep.subr.bf16.mxu1 %v1010_v17 }
  0x28   : > { %919 = vmatpush3.bf16.msra.mxu0 %v1008_v16 }
  0x29   : > { %920 = vmatprep.subr.bf16.mxu0 %v1009_v18 }
  0x2a   : > { %957 = vmatpush3.bf16.msra.mxu1 %v1010_v17 }
  0x2b   : > { %958 = vmatprep.subr.bf16.mxu1 %v1013_v21 }
  0x2c   : > { %921 = vmatpush3.bf16.msra.mxu0 %v1011_v19 }
  0x2d   : > { %922 = vmatprep.subr.bf16.mxu0 %v1012_v20 }
  0x2e   : > { %959 = vmatpush3.bf16.msra.mxu1 %v1013_v21 }
  0x2f   : > { %960 = vmatprep.subr.bf16.mxu1 %v1018_v25 }
  0x30   : > { %923 = vmatpush3.bf16.msra.mxu0 %v1014_v23 }
  0x32   : > { %961 = vmatpush3.bf16.msra.mxu1 %v1018_v25 }
  0x33   : > { %552 = vmatmul.mubr.bf16.vlgmr.msra.gmra.mrb[0].mxu0 %v1015_v26 }
  0x34   : > { %559 = vmatprep.mubr.bf16.mxu0 %v1021_v27 }
  0x35   : > { %963 = vmatmul.mubr.bf16.vlgmr.msra.gmra.mrb[0].mxu1 %v1020_v28 }
  0x3b   : > { %560 = vmatmul.mubr.bf16.gmra.mrb[4].mxu0 %v1023_v29  ;;  %v652_v29 = vshrl.u32 %v651_v24, 7 }
  0x3d   : > { %vm709_vm6 = vcmp.eq.s32.totalorder %v652_v29, 1  ;;  %vm708_vm7 = vcmp.eq.s32.totalorder %v652_v29, 0 }
 0x106   : > { %v924_v30 = vpop.f32.mrb[0].mxu0 }
 0x107   : > { %v925_v31 = vpop.f32.mrb[1].mxu0 }
 0x108   : > { %v926_v33 = vadd.f32 %v925_v31, %v924_v30  ;;  %v927_v34 = vpop.f32.mrb[2].mxu0  ;;  %v964_v36 = vpop.f32.mrb[0].mxu1 }
 0x109   : > { %v928_v35 = vpop.f32.mrb[3].mxu0  ;;  %v602_v39 = vpop.f32.mrb[1].mxu1 }
 0x10a   : > { %v929_v37 = vadd.f32 %v928_v35, %v927_v34  ;;  %v554_v38 = vadd.f32 %v926_v33, %v866_v32  ;;  %v965_v40 = vpop.f32.mrb[2].mxu1 }
 0x10b   : > { %v605_v43 = vpop.f32.mrb[3].mxu1 }
 0x10c   : > { %v603_v41 = vadd.f32 %v602_v39, %v554_v38  ;;  %v557_v42 = vadd.f32 %v929_v37, %v866_v32 }
 0x10e   : > { %vm617_vm0 = vcmp.ge.f32.partialorder %v603_v41, 0.0  ;;  %v621_v44 = vmul.f32 0.01, %v603_v41  ;;  %v606_v45 = vadd.f32 %v605_v43, %v557_v42  ;;  %v930_v46 = vpop.f32.mrb[4].mxu0 }
 0x10f   : > { %v931_v47 = vpop.f32.mrb[5].mxu0 }
 0x110   : > { %v625_v48 = vsel %vm617_vm0, %v603_v41, %v621_v44  ;;  %vm618_vm3 = vcmp.ge.f32.partialorder %v606_v45, 0.0  ;;  %v622_v49 = vmul.f32 0.01, %v606_v45  ;;  %v932_v50 = vadd.f32 %v931_v47, %v930_v46  ;;  %v933_v51 = vpop.f32.mrb[6].mxu0 }
 0x111   : > { %v904_v52 = vpack.c.bf16 %v625_v48, %v625_v48  ;;  %v691_v53 = vmul.f32 %v625_v48, %v625_v48  ;;  %v934_v54 = vpop.f32.mrb[7].mxu0  ;;  %v678_v58 = vsel %vm677_vm2, %v625_v48, 0.0 }
 0x112   : > { %v626_v55 = vsel %vm618_vm3, %v606_v45, %v622_v49  ;;  %v562_v56 = vadd.f32 %v932_v50, %v866_v32  ;;  %v935_v57 = vadd.f32 %v934_v54, %v933_v51 }
 0x113   : > { %646 = vst.msk [vmem:[%s1134_s6] sm:$0xf] %vm645_vm1, %v904_v52  ;;  %v905_v59 = vpack.c.bf16 %v626_v55, %v626_v55  ;;  %v679_v60 = vsel %vm677_vm2, %v626_v55, 0.0  ;;  %v692_v61 = vmul.f32 %v626_v55, %v626_v55  ;;  %v695_v1 = vsel %vm677_vm2, %v691_v53, 0.0 }
 0x114   : > { %v680_v62 = vadd.f32 %v679_v60, %v678_v58  ;;  %v611_v63 = vadd.f32 %v964_v36, %v562_v56  ;;  %v565_v0 = vadd.f32 %v935_v57, %v866_v32 }
 0x115   : > { %647 = vst.msk [vmem:[%s1134_s6 + $0x4] sm:$0xf] %vm645_vm1, %v905_v59  ;;  %v696_v2 = vsel %vm677_vm2, %v692_v61, 0.0 }
 0x116   : > { %v697_v3 = vadd.f32 %v696_v2, %v695_v1  ;;  %vm619_vm4 = vcmp.ge.f32.partialorder %v611_v63, 0.0  ;;  %v623_v4 = vmul.f32 0.01, %v611_v63  ;;  %v614_v5 = vadd.f32 %v965_v40, %v565_v0 }
 0x118   : > { %v627_v6 = vsel %vm619_vm4, %v611_v63, %v623_v4  ;;  %vm620_vm5 = vcmp.ge.f32.partialorder %v614_v5, 0.0  ;;  %v624_v7 = vmul.f32 0.01, %v614_v5 }
 0x119   : > { %v906_v8 = vpack.c.bf16 %v627_v6, %v627_v6  ;;  %v681_v9 = vsel %vm677_vm2, %v627_v6, 0.0  ;;  %v693_v10 = vmul.f32 %v627_v6, %v627_v6 }
 0x11a   : > { %v682_v11 = vadd.f32 %v681_v9, %v680_v62  ;;  %v628_v12 = vsel %vm620_vm5, %v614_v5, %v624_v7 }
 0x11b   : > { %648 = vst.msk [vmem:[%s1134_s6 + $0x8] sm:$0xf] %vm645_vm1, %v906_v8  ;;  %v698_v13 = vsel %vm677_vm2, %v693_v10, 0.0  ;;  %v907_v14 = vpack.c.bf16 %v628_v12, %v628_v12  ;;  %v683_v15 = vsel %vm677_vm2, %v628_v12, 0.0  ;;  %v694_v16 = vmul.f32 %v628_v12, %v628_v12 }
 0x11c   : > { %v699_v17 = vadd.f32 %v698_v13, %v697_v3  ;;  %v684_v18 = vadd.f32 %v683_v15, %v682_v11 }
 0x11d   : > { %649 = vst.msk [vmem:[%s1134_s6 + $0xc] sm:$0xf] %vm645_vm1, %v907_v14  ;;  %v700_v19 = vsel %vm677_vm2, %v694_v16, 0.0 }
 0x11e   : > { %v685_v20 = vrot.slane %v684_v18, 4  ;;  %v701_v21 = vadd.f32 %v700_v19, %v699_v17 }
 0x120   : > { %v686_v22 = vadd.f32 %v685_v20, %v684_v18  ;;  %v702_v23 = vrot.slane %v701_v21, 4 }
 0x122   : > { %v687_v25 = vrot.slane %v686_v22, 2  ;;  %v703_v26 = vadd.f32 %v702_v23, %v701_v21 }
 0x124   : > { %v688_v27 = vadd.f32 %v687_v25, %v686_v22  ;;  %v704_v28 = vrot.slane %v703_v26, 2 }
 0x126   : > { %v705_v30 = vadd.f32 %v704_v28, %v703_v26  ;;  %v689_v31 = vrot.slane %v688_v27, 1 }
 0x128   : > { %v706_v32 = vrot.slane %v705_v30, 1  ;;  %v690_v34 = vadd.f32 %v689_v31, %v688_v27 }
 0x12a   : > { %v707_v33 = vadd.f32 %v706_v32, %v705_v30 }
 0x12c   : > { %v710_v35 = vsel %vm709_vm6, %v707_v33, 0.0 }
 0x12d   : > { %v711_v36 = vsel %vm708_vm7, %v690_v34, %v710_v35 }
 0x12e   : > { %712 = vst.msk [vmem:[%s278_s10] sm:$0xff] %vm677_vm2, %v711_v36 }
 0x12f PF: > { %s15_s17 = sadd.s32 1, %s1046_s17   ;;  %s1171_s15 = smov %s1042_s16 }
 0x130   : > { %p12_p5 = scmp.ge.s32.totalorder %s15_s17, 6   ;;  %s1172_s16 = smov %s1174_s18 }
 0x132   :  { %14 = sbr.rel (!%p12_p5) target bundleno = 2 (0x2), region = 77 }

// kernel: net2d_forward.19
= control target key start
LH: loop header
LB: loop body
LE: loop exit
PB: predicated region body
PF: predicated region fallthrough
CT: control target
= control target key end

     0   :  { %vm92_vm0 = vcmask 130048   ;;  %vm286_vm1 = vcmask 261120   ;;  %vm503_vm2 = vcmask 7168   ;;  %s974_s2 = inlined_call_operand.vmem [shape: f32[32,1], index: 2, kind: input, shape index: {}]   ;;  %s975_s3 = inlined_call_operand.vmem [shape: f32[16,1], index: 3, kind: input, shape index: {}]   ;;  %s976_s1 = inlined_call_operand.vmem [shape: bf16[128,16], index: 1, kind: input, shape index: {}]   ;;  %s977_s0 = inlined_call_operand.vmem [shape: bf16[128,32], index: 0, kind: input, shape index: {}]   ;;  %s978_s4 = inlined_call_operand.<no memory space> [shape: f32[1,1], index: 4, kind: input, shape index: {}]   ;;  %s979_s5 = inlined_call_operand.vmem [shape: f32[128,1], index: 5, kind: output, shape index: {}]  }
   0x1   :  { %v54_v0 = vld [vmem:[%s974_s2] sm:$0xff]  ;;  %v55_v1 = vld [vmem:[%s974_s2 + $0x8] sm:$0xff]  ;;  %v56_v5 = vld [vmem:[%s974_s2 + $0x10] sm:$0xff]  ;;  %v10_v57 = vstv %s978_s4 }
   0x2   :  { %v90_v2 = vld [vmem:[%s975_s3] sm:$0xff]  ;;  %v737_v3 = vpack.c.bf16 %v55_v1, %v54_v0  ;;  %v91_v4 = vld [vmem:[%s975_s3 + $0x8] sm:$0xff]  ;;  %v57_v6 = vld [vmem:[%s974_s2 + $0x18] sm:$0xff]  ;;  %11 = vst [vmem:[#allocation2] sm:$0x1] %v10_v57 }
   0x3   :  { %v733_v7 = vpack.c.bf16 %v91_v4, %v90_v2  ;;  %v741_v8 = vpack.c.bf16 %v57_v6, %v56_v5  ;;  %v590_v9 = vld [vmem:[%s976_s1] sm:$0xff]   ;;  %v628_v11 = vld [vmem:[%s976_s1 + $0x8] sm:$0xff]   ;;  %v629_v17 = vld [vmem:[%s976_s1 + $0x10] sm:$0xff]  }
   0x4   :  { %v558_v10 = vld [vmem:[%s977_s0] sm:$0xff]   ;;  %738 = vmatprep.subr.bf16.mxu0 %v737_v3  ;;  %v591_v12 = vunpack.c.l.bf16 %v590_v9  ;;  %v592_v14 = vunpack.c.h.bf16 %v590_v9  ;;  %v595_v15 = vunpack.c.l.bf16 %v628_v11  ;;  %v621_v16 = vld [vmem:[%s977_s0 + $0x8] sm:$0xff]   ;;  %v596_v19 = vunpack.c.h.bf16 %v628_v11  ;;  %v622_v22 = vld [vmem:[%s977_s0 + $0x10] sm:$0xff]  }
   0x5   :  { %v559_v13 = vunpack.c.l.bf16 %v558_v10  ;;  %740 = vmatpush3.bf16.msra.mxu0 %v737_v3  ;;  %734 = vmatprep.subr.bf16.mxu1 %v733_v7  ;;  %v560_v18 = vunpack.c.h.bf16 %v558_v10  ;;  %v563_v20 = vunpack.c.l.bf16 %v621_v16  ;;  %v599_v21 = vunpack.c.l.bf16 %v629_v17  ;;  %v630_v23 = vld [vmem:[%s976_s1 + $0x18] sm:$0xff]   ;;  %v631_v29 = vld [vmem:[%s976_s1 + $0x20] sm:$0xff]   ;;  %v632_v35 = vld [vmem:[%s976_s1 + $0x28] sm:$0xff]  }
   0x6   :  { %736 = vmatpush3.bf16.msra.mxu1 %v733_v7  ;;  %742 = vmatprep.subr.bf16.mxu0 %v741_v8  ;;  %v564_v24 = vunpack.c.h.bf16 %v621_v16  ;;  %v600_v25 = vunpack.c.h.bf16 %v629_v17  ;;  %v567_v26 = vunpack.c.l.bf16 %v622_v22  ;;  %v603_v27 = vunpack.c.l.bf16 %v630_v23  ;;  %v623_v28 = vld [vmem:[%s977_s0 + $0x18] sm:$0xff]   ;;  %v624_v34 = vld [vmem:[%s977_s0 + $0x20] sm:$0xff]   ;;  %v625_v40 = vld [vmem:[%s977_s0 + $0x28] sm:$0xff]  }
   0x7   :  { %677 = vmatprep.mubr.msk.f32.mxu1 %vm92_vm0, %v591_v12  ;;  %709 = vmatprep.mubr.msk.f32.mxu0 %vm286_vm1, %v559_v13  ;;  %v568_v30 = vunpack.c.h.bf16 %v622_v22  ;;  %v604_v31 = vunpack.c.h.bf16 %v630_v23  ;;  %v571_v32 = vunpack.c.l.bf16 %v623_v28  ;;  %v607_v33 = vunpack.c.l.bf16 %v631_v29  ;;  %v633_v41 = vld [vmem:[%s976_s1 + $0x30] sm:$0xff]   ;;  %v634_v47 = vld [vmem:[%s976_s1 + $0x38] sm:$0xff]  }
   0x8   :  { %v572_v36 = vunpack.c.h.bf16 %v623_v28  ;;  %v608_v37 = vunpack.c.h.bf16 %v631_v29  ;;  %v575_v38 = vunpack.c.l.bf16 %v624_v34  ;;  %v611_v39 = vunpack.c.l.bf16 %v632_v35  ;;  %v626_v46 = vld [vmem:[%s977_s0 + $0x30] sm:$0xff]   ;;  %v627_v52 = vld [vmem:[%s977_s0 + $0x38] sm:$0xff]  }
   0x9   :  { %744 = vmatpush3.bf16.msra.mxu0 %v741_v8  ;;  %678 = vmatmul.mubr.msk.f32.vlgmr.msra.gmra.mrb[0].mxu1 %vm92_vm0, %v592_v14  ;;  %v576_v42 = vunpack.c.h.bf16 %v624_v34  ;;  %v612_v43 = vunpack.c.h.bf16 %v632_v35  ;;  %v579_v44 = vunpack.c.l.bf16 %v625_v40  ;;  %v615_v45 = vunpack.c.l.bf16 %v633_v41  ;;  %v892_v61 = vld [vmem:[#allocation2] ss:$0 sm:$0xff] }
   0xa   :  { %680 = vmatprep.mubr.msk.f32.mxu1 %vm92_vm0, %v595_v15  ;;  %v580_v48 = vunpack.c.h.bf16 %v625_v40  ;;  %v616_v49 = vunpack.c.h.bf16 %v633_v41  ;;  %v583_v50 = vunpack.c.l.bf16 %v626_v46  ;;  %v619_v51 = vunpack.c.l.bf16 %v634_v47 }
   0xb   :  { %v584_v53 = vunpack.c.h.bf16 %v626_v46  ;;  %v620_v54 = vunpack.c.h.bf16 %v634_v47  ;;  %v587_v55 = vunpack.c.l.bf16 %v627_v52  ;;  %v588_v56 = vunpack.c.h.bf16 %v627_v52 }
   0xc   :  { %710 = vmatmul.mubr.msk.f32.vlgmr.msra.gmra.mrb[0].mxu0 %vm286_vm1, %v560_v18 }
   0xd   :  { %681 = vmatmul.mubr.msk.f32.gmra.mrb[2].mxu1 %vm92_vm0, %v596_v19  ;;  %712 = vmatprep.mubr.msk.f32.mxu0 %vm286_vm1, %v563_v20 }
   0xe   :  { %683 = vmatprep.mubr.msk.f32.mxu1 %vm92_vm0, %v599_v21 }
  0x10   :  { %713 = vmatmul.mubr.msk.f32.gmra.mrb[2].mxu0 %vm286_vm1, %v564_v24 }
  0x11   :  { %684 = vmatmul.mubr.msk.f32.gmra.mrb[4].mxu1 %vm92_vm0, %v600_v25  ;;  %715 = vmatprep.mubr.msk.f32.mxu0 %vm286_vm1, %v567_v26 }
  0x12   :  { %686 = vmatprep.mubr.msk.f32.mxu1 %vm92_vm0, %v603_v27 }
  0x14   :  { %716 = vmatmul.mubr.msk.f32.gmra.mrb[4].mxu0 %vm286_vm1, %v568_v30 }
  0x15   :  { %687 = vmatmul.mubr.msk.f32.gmra.mrb[6].mxu1 %vm92_vm0, %v604_v31  ;;  %718 = vmatprep.mubr.msk.f32.mxu0 %vm286_vm1, %v571_v32 }
  0x16   :  { %689 = vmatprep.mubr.msk.f32.mxu1 %vm92_vm0, %v607_v33 }
  0x18   :  { %719 = vmatmul.mubr.msk.f32.gmra.mrb[6].mxu0 %vm286_vm1, %v572_v36 }
  0x19   :  { %690 = vmatmul.mubr.msk.f32.gmra.mrb[8].mxu1 %vm92_vm0, %v608_v37  ;;  %721 = vmatprep.mubr.msk.f32.mxu0 %vm286_vm1, %v575_v38 }
  0x1a   :  { %692 = vmatprep.mubr.msk.f32.mxu1 %vm92_vm0, %v611_v39 }
  0x1c   :  { %722 = vmatmul.mubr.msk.f32.gmra.mrb[8].mxu0 %vm286_vm1, %v576_v42 }
  0x1d   :  { %693 = vmatmul.mubr.msk.f32.gmra.mrb[10].mxu1 %vm92_vm0, %v612_v43  ;;  %724 = vmatprep.mubr.msk.f32.mxu0 %vm286_vm1, %v579_v44 }
  0x1e   :  { %695 = vmatprep.mubr.msk.f32.mxu1 %vm92_vm0, %v615_v45 }
  0x20   :  { %725 = vmatmul.mubr.msk.f32.gmra.mrb[10].mxu0 %vm286_vm1, %v580_v48 }
  0x21   :  { %696 = vmatmul.mubr.msk.f32.gmra.mrb[12].mxu1 %vm92_vm0, %v616_v49  ;;  %727 = vmatprep.mubr.msk.f32.mxu0 %vm286_vm1, %v583_v50 }
  0x22   :  { %698 = vmatprep.mubr.msk.f32.mxu1 %vm92_vm0, %v619_v51 }
  0x24   :  { %728 = vmatmul.mubr.msk.f32.gmra.mrb[12].mxu0 %vm286_vm1, %v584_v53 }
  0x25   :  { %699 = vmatmul.mubr.msk.f32.gmra.mrb[14].mxu1 %vm92_vm0, %v620_v54  ;;  %730 = vmatprep.mubr.msk.f32.mxu0 %vm286_vm1, %v587_v55 }
  0x28   :  { %731 = vmatmul.mubr.msk.f32.gmra.mrb[14].mxu0 %vm286_vm1, %v588_v56 }
  0xdc   :  { %v679_v58 = vpop.f32.mrb[0].mxu1 }
  0xdd   :  { %v207_v59 = vpop.f32.mrb[1].mxu1 }
  0xdf   :  { %v711_v60 = vpop.f32.mrb[0].mxu0 }
  0xe0   :  { %v407_v62 = vadd.f32 %v711_v60, %v679_v58  ;;  %v401_v63 = vpop.f32.mrb[1].mxu0  ;;  %v682_v0 = vpop.f32.mrb[2].mxu1 }
  0xe1   :  { %v402_v1 = vadd.f32 %v401_v63, %v207_v59  ;;  %v217_v2 = vpop.f32.mrb[3].mxu1 }
  0xe2   :  { %v488_v3 = vadd.f32 %v892_v61, %v407_v62 }
  0xe3   :  { %v487_v4 = vadd.f32 %v892_v61, %v402_v1  ;;  %v714_v5 = vpop.f32.mrb[2].mxu0 }
  0xe4   :  { %505 = vst.msk [vmem:[%s979_s5 + $0x8] sm:$0xff] %vm503_vm2, %v488_v3  ;;  %v417_v6 = vadd.f32 %v714_v5, %v682_v0  ;;  %v411_v7 = vpop.f32.mrb[3].mxu0  ;;  %v685_v8 = vpop.f32.mrb[4].mxu1 }
  0xe5   :  { %504 = vst.msk [vmem:[%s979_s5] sm:$0xff] %vm503_vm2, %v487_v4  ;;  %v412_v9 = vadd.f32 %v411_v7, %v217_v2  ;;  %v227_v10 = vpop.f32.mrb[5].mxu1 }
  0xe6   :  { %v490_v11 = vadd.f32 %v892_v61, %v417_v6 }
  0xe7   :  { %v489_v12 = vadd.f32 %v892_v61, %v412_v9  ;;  %v717_v13 = vpop.f32.mrb[4].mxu0 }
  0xe8   :  { %507 = vst.msk [vmem:[%s979_s5 + $0x18] sm:$0xff] %vm503_vm2, %v490_v11  ;;  %v427_v14 = vadd.f32 %v717_v13, %v685_v8  ;;  %v421_v15 = vpop.f32.mrb[5].mxu0  ;;  %v688_v16 = vpop.f32.mrb[6].mxu1 }
  0xe9   :  { %506 = vst.msk [vmem:[%s979_s5 + $0x10] sm:$0xff] %vm503_vm2, %v489_v12  ;;  %v422_v17 = vadd.f32 %v421_v15, %v227_v10  ;;  %v237_v18 = vpop.f32.mrb[7].mxu1 }
  0xea   :  { %v492_v19 = vadd.f32 %v892_v61, %v427_v14 }
  0xeb   :  { %v491_v20 = vadd.f32 %v892_v61, %v422_v17  ;;  %v720_v21 = vpop.f32.mrb[6].mxu0 }
  0xec   :  { %509 = vst.msk [vmem:[%s979_s5 + $0x28] sm:$0xff] %vm503_vm2, %v492_v19  ;;  %v437_v22 = vadd.f32 %v720_v21, %v688_v16  ;;  %v431_v23 = vpop.f32.mrb[7].mxu0  ;;  %v691_v24 = vpop.f32.mrb[8].mxu1 }
  0xed   :  { %508 = vst.msk [vmem:[%s979_s5 + $0x20] sm:$0xff] %vm503_vm2, %v491_v20  ;;  %v432_v25 = vadd.f32 %v431_v23, %v237_v18  ;;  %v247_v26 = vpop.f32.mrb[9].mxu1 }
  0xee   :  { %v494_v27 = vadd.f32 %v892_v61, %v437_v22 }
  0xef   :  { %v493_v28 = vadd.f32 %v892_v61, %v432_v25  ;;  %v723_v29 = vpop.f32.mrb[8].mxu0 }
  0xf0   :  { %511 = vst.msk [vmem:[%s979_s5 + $0x38] sm:$0xff] %vm503_vm2, %v494_v27  ;;  %v447_v30 = vadd.f32 %v723_v29, %v691_v24  ;;  %v441_v31 = vpop.f32.mrb[9].mxu0  ;;  %v694_v32 = vpop.f32.mrb[10].mxu1 }
  0xf1   :  { %510 = vst.msk [vmem:[%s979_s5 + $0x30] sm:$0xff] %vm503_vm2, %v493_v28  ;;  %v442_v33 = vadd.f32 %v441_v31, %v247_v26  ;;  %v257_v34 = vpop.f32.mrb[11].mxu1 }
  0xf2   :  { %v496_v35 = vadd.f32 %v892_v61, %v447_v30 }
  0xf3   :  { %v495_v36 = vadd.f32 %v892_v61, %v442_v33  ;;  %v726_v37 = vpop.f32.mrb[10].mxu0 }
  0xf4   :  { %513 = vst.msk [vmem:[%s979_s5 + $0x48] sm:$0xff] %vm503_vm2, %v496_v35  ;;  %v457_v38 = vadd.f32 %v726_v37, %v694_v32  ;;  %v451_v39 = vpop.f32.mrb[11].mxu0  ;;  %v697_v40 = vpop.f32.mrb[12].mxu1 }
  0xf5   :  { %512 = vst.msk [vmem:[%s979_s5 + $0x40] sm:$0xff] %vm503_vm2, %v495_v36  ;;  %v452_v41 = vadd.f32 %v451_v39, %v257_v34  ;;  %v267_v42 = vpop.f32.mrb[13].mxu1 }
  0xf6   :  { %v498_v43 = vadd.f32 %v892_v61, %v457_v38 }
  0xf7   :  { %v497_v44 = vadd.f32 %v892_v61, %v452_v41  ;;  %v729_v45 = vpop.f32.mrb[12].mxu0 }
  0xf8   :  { %515 = vst.msk [vmem:[%s979_s5 + $0x58] sm:$0xff] %vm503_vm2, %v498_v43  ;;  %v467_v46 = vadd.f32 %v729_v45, %v697_v40  ;;  %v461_v47 = vpop.f32.mrb[13].mxu0  ;;  %v700_v48 = vpop.f32.mrb[14].mxu1 }
  0xf9   :  { %514 = vst.msk [vmem:[%s979_s5 + $0x50] sm:$0xff] %vm503_vm2, %v497_v44  ;;  %v462_v49 = vadd.f32 %v461_v47, %v267_v42  ;;  %v277_v50 = vpop.f32.mrb[15].mxu1 }
  0xfa   :  { %v500_v51 = vadd.f32 %v892_v61, %v467_v46 }
  0xfb   :  { %v499_v52 = vadd.f32 %v892_v61, %v462_v49  ;;  %v732_v53 = vpop.f32.mrb[14].mxu0 }
  0xfc   :  { %517 = vst.msk [vmem:[%s979_s5 + $0x68] sm:$0xff] %vm503_vm2, %v500_v51  ;;  %v477_v54 = vadd.f32 %v732_v53, %v700_v48  ;;  %v471_v55 = vpop.f32.mrb[15].mxu0 }
  0xfd   :  { %516 = vst.msk [vmem:[%s979_s5 + $0x60] sm:$0xff] %vm503_vm2, %v499_v52  ;;  %v472_v56 = vadd.f32 %v471_v55, %v277_v50 }
  0xfe   :  { %v502_v57 = vadd.f32 %v892_v61, %v477_v54 }
  0xff   :  { %v501_v58 = vadd.f32 %v892_v61, %v472_v56 }
 0x100   :  { %519 = vst.msk [vmem:[%s979_s5 + $0x78] sm:$0xff] %vm503_vm2, %v502_v57 }
 0x101   :  { %518 = vst.msk [vmem:[%s979_s5 + $0x70] sm:$0xff] %vm503_vm2, %v501_v58 }

</bundles_post_ra>
